<compile_context>
chip_gen: v6e
topology: v6e:2x2x1
jax: 0.10.0
libtpu: 0.0.40
codegen_flags: <defaults>
</compile_context>

<pallas_src>
import jax
import jax.numpy as jnp
import numpy as np
from jax import lax
from jax.experimental import pallas as pl
from jax.experimental.pallas import tpu as pltpu

_KS = tuple(range(2, 7))      # conv kernel sizes 2..6
_MAX_K = max(_KS)             # 6 shift groups
_LEX_PAD = 128                # lex features zero-padded to one full lane tile
_NEG = -1e30                  # large finite negative for the time mask


def _round_up(x, m):
    return (x + m - 1) // m * m


def _mm_nt(a, b):
    """(M, K) x (N, K) -> (M, N)  ==  a @ b.T with f32 MXU accumulation."""
    return lax.dot_general(a, b, (((1,), (1,)), ((), ())),
                           preferred_element_type=jnp.float32)


def anger2_kernel(embeds_ref, lex_ref, wall_ref, mask_ref, ball_ref,
                  fc1wct_ref, fc1wlt_ref, fc1b_ref, fc2w_ref, fc2b_ref,
                  out_ref):
    n_rows, _ = embeds_ref.shape            # n_rows = b_tile * l_pad
    l_pad, gw = mask_ref.shape              # padded seq len, conv-feature width
    bt = out_ref.shape[-1]                  # batch tile
    n_shift = wall_ref.shape[1] // gw       # = _MAX_K shift groups

    # (1) One fused MXU matmul covering every conv tap of every kernel size.
    p = jnp.dot(embeds_ref[...], wall_ref[...],
                preferred_element_type=jnp.float32)           # (n_rows, 6*gw)

    # (2) conv_k(t) = sum_j x[t+j] @ W_k[j]: <=5 lane-aligned 128-wide slab
    #     adds of time-rolled segments.  Wrapped rows only ever hit
    #     zero-padded taps (j >= k) or rows the mask kills before the max.
    acc = p[:, 0:gw]
    for j in range(1, n_shift):
        acc = acc + pltpu.roll(p[:, j * gw:(j + 1) * gw],
                               shift=n_rows - j, axis=0)

    # (3) Single masked max over time (mask removes invalid trailing rows and
    #     the zero time-padding); conv bias added after the max (bias is
    #     time-invariant, so max(x + b) == max(x) + b).
    acc = acc.reshape(bt, l_pad, gw) + mask_ref[...][None]    # no-op reshape
    feats = jnp.max(acc, axis=1) + ball_ref[...]              # (bt, gw)

    # TODO(synk): nn.Dropout(p=0.5) is identity in this eval-mode forward.
    # (4) fc1 / fc2 computed with the batch on the LANE axis (transposed
    #     matmuls), so the final store is lane-dense with no relayout.
    h_t = jax.nn.sigmoid(_mm_nt(fc1wct_ref[...], feats)
                         + _mm_nt(fc1wlt_ref[...], lex_ref[...])
                         + fc1b_ref[...])                     # (dense, bt)
    o_t = jax.nn.sigmoid(jnp.dot(fc2w_ref[...], h_t,
                                 preferred_element_type=jnp.float32)
                         + fc2b_ref[...])                     # (1, bt)
    out_ref[...] = o_t.reshape(1, 1, bt).astype(out_ref.dtype)


def pack_params(params, channels, out_channel, compute_dtype=jnp.float32):
    """Host-side packing into shift-major, lane-aligned, transposed operands."""
    c, oc = channels, out_channel
    ncf = oc * len(_KS)                        # raw conv-feature count (5*OC)
    gw = _round_up(ncf, 128)                   # lane-aligned conv-feature width

    # Shift-major conv weights: group j = [W2[j]|W3[j]|W4[j]|W5[j]|W6[j]|pad],
    # zeros for absent taps (j >= k), zero lane padding up to gw.
    cols = []
    for j in range(_MAX_K):
        for k in _KS:
            cols.append(params[f'w{k}'][j] if j < k
                        else jnp.zeros((c, oc), jnp.float32))
        if gw > ncf:
            cols.append(jnp.zeros((c, gw - ncf), jnp.float32))
    w_all = jnp.concatenate(cols, axis=1).astype(compute_dtype)  # (c, 6*gw)

    b_all = jnp.concatenate([params[f'b{k}'] for k in _KS], axis=1)
    b_all = jnp.pad(b_all, ((0, 0), (0, gw - ncf)))               # (1, gw)

    dense = params['fc1w'].shape[1]
    nlex = params['fc1w'].shape[0] - ncf
    fc1w_conv_t = jnp.zeros((dense, gw), jnp.float32)
    fc1w_conv_t = fc1w_conv_t.at[:, :ncf].set(params['fc1w'][:ncf].T)
    fc1w_lex_t = jnp.zeros((dense, _LEX_PAD), jnp.float32)
    fc1w_lex_t = fc1w_lex_t.at[:, :nlex].set(params['fc1w'][ncf:].T)

    return dict(
        w_all=w_all, b_all=b_all, oc=oc, nlex=nlex,
        fc1w_conv_t=fc1w_conv_t, fc1w_lex_t=fc1w_lex_t,
        fc1b_col=params['fc1b'].reshape(dense, 1),    # (dense, 1)
        fc2w_row=params['fc2w'].reshape(1, dense),    # (1, dense)
        fc2b=params['fc2b'])                          # (1, 1)


def _time_mask(l_valid, l_pad, oc, gw):
    """(l_pad, gw) additive mask: -1e30 on rows that are invalid for conv_k."""
    mask = np.zeros((l_pad, gw), np.float32)
    off = 0
    for k in _KS:
        mask[l_valid - k + 1:, off:off + oc] = _NEG
        off += oc
    return jnp.asarray(mask)


def anger2_forward(embeds, lex_x, packed, *, b_tile=None):
    b, seq_len, chans = embeds.shape
    assert seq_len >= _MAX_K, "sequence must be >= the widest conv kernel"

    w_all = packed['w_all']
    gw = packed['b_all'].shape[1]
    n_shift = w_all.shape[1] // gw
    l_pad = _round_up(seq_len, 8)              # makes in-kernel reshapes no-ops

    if b_tile is None:
        # Large tiles amortize the ~0.35us/step grid overhead; keep the f32 P
        # intermediate (b_tile*l_pad x 6*gw) near ~16 MiB so it fits the scoped
        # VMEM limit on every generation (v7x has only 64 MiB per core).
        p_row_bytes = l_pad * n_shift * gw * 4
        cap = max(8, (16 << 20) // p_row_bytes)
        b_tile = int(max(8, min(1024, (cap // 8) * 8, _round_up(b, 8))))
    assert b_tile % 8 == 0, "b_tile must be a multiple of 8"

    b_pad = _round_up(b, b_tile)               # ragged batches are zero-padded
    num_tiles = b_pad // b_tile

    # Host-side layout plumbing: pad time to l_pad, pad batch to b_pad,
    # flatten embeds to 2-D (lane-dense, reshape-free kernel input).
    emb = jnp.pad(embeds, ((0, b_pad - b), (0, l_pad - seq_len), (0, 0)))
    emb2 = emb.astype(w_all.dtype).reshape(b_pad * l_pad, chans)

    lex_pad = jnp.zeros((b_pad, _LEX_PAD), jnp.float32)
    lex_pad = lex_pad.at[:b, :lex_x.shape[1]].set(lex_x.astype(jnp.float32))

    mask = _time_mask(seq_len, l_pad, packed['oc'], gw)

    def _fixed(shape):
        nd = len(shape)
        return pl.BlockSpec(shape, lambda i, _nd=nd: (0,) * _nd)

    in_specs = [
        pl.BlockSpec((b_tile * l_pad, chans), lambda i: (i, 0)),   # embeds
        pl.BlockSpec((b_tile, _LEX_PAD), lambda i: (i, 0)),        # lex
        _fixed(w_all.shape), _fixed(mask.shape), _fixed(packed['b_all'].shape),
        _fixed(packed['fc1w_conv_t'].shape), _fixed(packed['fc1w_lex_t'].shape),
        _fixed(packed['fc1b_col'].shape), _fixed(packed['fc2w_row'].shape),
        _fixed(packed['fc2b'].shape),
    ]
    # Lane-dense output: batch lives on the lane axis of each (1,1,b_tile)
    # block (unmasked full vst once b_tile >= 128).
    out_specs = pl.BlockSpec((1, 1, b_tile), lambda i: (i, 0, 0))

    out = pl.pallas_call(
        anger2_kernel,
        out_shape=jax.ShapeDtypeStruct((num_tiles, 1, b_tile), jnp.float32),
        grid=(num_tiles,),
        in_specs=in_specs,
        out_specs=out_specs,
        compiler_params=pltpu.CompilerParams(
            dimension_semantics=("parallel",),       # megacore-shard the batch
            vmem_limit_bytes=48 * 1024 * 1024),      # safe on v5e/v6e/v7x
    )(emb2, lex_pad, w_all, mask, packed['b_all'],
      packed['fc1w_conv_t'], packed['fc1w_lex_t'],
      packed['fc1b_col'], packed['fc2w_row'], packed['fc2b'])

    return out.reshape(b_pad, 1)[:b]


def reference_forward(embeds, lex_x, params):
    """Pure-JAX reference mirroring the PyTorch module math."""
    B, L, C = embeds.shape
    feats = []
    for k in _KS:
        W = params[f'w{k}']                  # (k, C, OC)
        bias = params[f'b{k}']               # (1, OC)
        lout = L - k + 1
        acc = jnp.zeros((B, lout, W.shape[-1]), jnp.float32)
        for j in range(k):
            acc = acc + jnp.einsum('blc,co->blo', embeds[:, j:j + lout, :], W[j])
        acc = acc + bias[None]
        feats.append(jnp.max(acc, axis=1))
    feats.append(lex_x)
    f = jnp.concatenate(feats, axis=1)
    h = jax.nn.sigmoid(f @ params['fc1w'] + params['fc1b'])
    return jax.nn.sigmoid(h @ params['fc2w'] + params['fc2b'])


if __name__ == "__main__":
    # Small, module-consistent sizes.
    vocab, emb_dim = 50, 32
    pos_num = 10                         # module hardcodes a 24-d pos embedding
    out_channel = 16
    n_gram_num = 5
    dense_out = 32
    B, L = 16, 12                        # batch gridded into tiles of 8
    C = emb_dim + 24                     # 56
    feat_dim = out_channel * n_gram_num + 3  # 83

    key = jax.random.PRNGKey(0)
    ks = jax.random.split(key, 16)

    emb_w = jax.random.normal(ks[0], (vocab, emb_dim), jnp.float32) * 0.1
    pos_w = jax.random.normal(ks[1], (pos_num, 24), jnp.float32) * 0.1

    params = {}
    for i, k in enumerate(_KS):
        # PyTorch Conv1d weight is (OC, C, k); stored as (k, C, OC) for packing.
        params[f'w{k}'] = jax.random.normal(
            ks[2 + i], (k, C, out_channel), jnp.float32) * 0.05
        params[f'b{k}'] = jax.random.normal(
            ks[7 + i], (1, out_channel), jnp.float32) * 0.05
    # PyTorch Linear weight is (out, in); stored transposed (in, out).
    params['fc1w'] = jax.random.normal(ks[12], (feat_dim, dense_out), jnp.float32) * 0.05
    params['fc1b'] = jax.random.normal(ks[13], (1, dense_out), jnp.float32) * 0.05
    params['fc2w'] = jax.random.normal(ks[14], (dense_out, 1), jnp.float32) * 0.05
    params['fc2b'] = jax.random.normal(ks[15], (1, 1), jnp.float32) * 0.05

    kx, klex, kpos = jax.random.split(jax.random.PRNGKey(1), 3)
    x = jax.random.randint(kx, (B, L), 0, vocab, dtype=jnp.int32)
    lex_x = jax.random.normal(klex, (B, 3), jnp.float32)
    pos_x = jax.random.randint(kpos, (B, L), 0, pos_num, dtype=jnp.int32)

    # Embedding lookups + concat kept in plain JAX (gather glue), channels-last.
    embeds = jnp.concatenate(
        [jnp.take(emb_w, x, axis=0), jnp.take(pos_w, pos_x, axis=0)], axis=2)

    ref = reference_forward(embeds, lex_x, params)

    # f32 path (tight check), gridded into two batch tiles.
    packed_f32 = pack_params(params, C, out_channel, compute_dtype=jnp.float32)
    out_f32 = jax.block_until_ready(
        anger2_forward(embeds, lex_x, packed_f32, b_tile=8))
    np.testing.assert_allclose(np.asarray(out_f32), np.asarray(ref),
                               rtol=2e-5, atol=2e-5)

    # bf16 streaming-operand path (f32 accumulation), looser tolerance.
    packed_bf16 = pack_params(params, C, out_channel, compute_dtype=jnp.bfloat16)
    out_bf16 = jax.block_until_ready(
        anger2_forward(embeds, lex_x, packed_bf16, b_tile=8))
    np.testing.assert_allclose(np.asarray(out_bf16), np.asarray(ref),
                               rtol=1e-2, atol=1e-2)

    print("KERNEL_OK")
</pallas_src>

<mosaic_0001>
module attributes {stable_mosaic.version = 11 : i64} {
  func.func @anger2_kernel(%arg0: i32, %arg1: memref<128x56xf32, #tpu.memory_space<vmem>>, %arg2: memref<8x128xf32, #tpu.memory_space<vmem>>, %arg3: memref<56x768xf32, #tpu.memory_space<vmem>>, %arg4: memref<16x128xf32, #tpu.memory_space<vmem>>, %arg5: memref<1x128xf32, #tpu.memory_space<vmem>>, %arg6: memref<32x128xf32, #tpu.memory_space<vmem>>, %arg7: memref<32x128xf32, #tpu.memory_space<vmem>>, %arg8: memref<32x1xf32, #tpu.memory_space<vmem>>, %arg9: memref<1x32xf32, #tpu.memory_space<vmem>>, %arg10: memref<1x1xf32, #tpu.memory_space<vmem>>, %arg11: memref<1x1x8xf32, #tpu.memory_space<vmem>>) attributes {dimension_semantics = [#tpu.dimension_semantics<parallel>], iteration_bounds = array<i64: 2>, scalar_prefetch = 0 : i64, scratch_operands = 0 : i64, tpu.core_type = #tpu.core_type<tc>, window_params = [{transform_indices = @transform_0, window_bounds = array<i64: 128, 56>}, {transform_indices = @transform_1, window_bounds = array<i64: 8, 128>}, {pipeline_mode = #tpu.pipeline_mode<synchronous>, transform_indices = @transform_2, window_bounds = array<i64: 56, 768>}, {pipeline_mode = #tpu.pipeline_mode<synchronous>, transform_indices = @transform_3, window_bounds = array<i64: 16, 128>}, {pipeline_mode = #tpu.pipeline_mode<synchronous>, transform_indices = @transform_4, window_bounds = array<i64: 1, 128>}, {pipeline_mode = #tpu.pipeline_mode<synchronous>, transform_indices = @transform_5, window_bounds = array<i64: 32, 128>}, {pipeline_mode = #tpu.pipeline_mode<synchronous>, transform_indices = @transform_6, window_bounds = array<i64: 32, 128>}, {pipeline_mode = #tpu.pipeline_mode<synchronous>, transform_indices = @transform_7, window_bounds = array<i64: 32, 1>}, {pipeline_mode = #tpu.pipeline_mode<synchronous>, transform_indices = @transform_8, window_bounds = array<i64: 1, 32>}, {pipeline_mode = #tpu.pipeline_mode<synchronous>, transform_indices = @transform_9, window_bounds = array<i64: 1, 1>}, {transform_indices = @transform_10, window_bounds = array<i64: 1, 1, 8>}]} {
    %c0 = arith.constant 0 : index
    %c0_0 = arith.constant 0 : index
    %0 = vector.load %arg1[%c0, %c0_0] : memref<128x56xf32, #tpu.memory_space<vmem>>, vector<128x56xf32>
    %c0_1 = arith.constant 0 : index
    %c0_2 = arith.constant 0 : index
    %1 = vector.load %arg3[%c0_1, %c0_2] : memref<56x768xf32, #tpu.memory_space<vmem>>, vector<56x768xf32>
    %cst = arith.constant dense<0.000000e+00> : vector<128x768xf32>
    %2 = tpu.matmul %0, %1, %cst {dimension_numbers = #tpu.dot_dimension_numbers<[1], [0], [0], [1], [0, 0, 1, 1], [], []>} : vector<128x56xf32>, vector<56x768xf32>, vector<128x768xf32> -> vector<128x768xf32>
    %3 = vector.extract_strided_slice %2 {offsets = [0, 0], sizes = [128, 128], strides = [1, 1]} : vector<128x768xf32> to vector<128x128xf32>
    %4 = vector.extract_strided_slice %2 {offsets = [0, 128], sizes = [128, 128], strides = [1, 1]} : vector<128x768xf32> to vector<128x128xf32>
    %c127_i32 = arith.constant 127 : i32
    %5 = tpu.dynamic_rotate %4 by %c127_i32 dim 0 : vector<128x128xf32>, i32 -> vector<128x128xf32>
    %6 = arith.addf %3, %5 : vector<128x128xf32>
    %7 = vector.extract_strided_slice %2 {offsets = [0, 256], sizes = [128, 128], strides = [1, 1]} : vector<128x768xf32> to vector<128x128xf32>
    %c126_i32 = arith.constant 126 : i32
    %8 = tpu.dynamic_rotate %7 by %c126_i32 dim 0 : vector<128x128xf32>, i32 -> vector<128x128xf32>
    %9 = arith.addf %6, %8 : vector<128x128xf32>
    %10 = vector.extract_strided_slice %2 {offsets = [0, 384], sizes = [128, 128], strides = [1, 1]} : vector<128x768xf32> to vector<128x128xf32>
    %c125_i32 = arith.constant 125 : i32
    %11 = tpu.dynamic_rotate %10 by %c125_i32 dim 0 : vector<128x128xf32>, i32 -> vector<128x128xf32>
    %12 = arith.addf %9, %11 : vector<128x128xf32>
    %13 = vector.extract_strided_slice %2 {offsets = [0, 512], sizes = [128, 128], strides = [1, 1]} : vector<128x768xf32> to vector<128x128xf32>
    %c124_i32 = arith.constant 124 : i32
    %14 = tpu.dynamic_rotate %13 by %c124_i32 dim 0 : vector<128x128xf32>, i32 -> vector<128x128xf32>
    %15 = arith.addf %12, %14 : vector<128x128xf32>
    %16 = vector.extract_strided_slice %2 {offsets = [0, 640], sizes = [128, 128], strides = [1, 1]} : vector<128x768xf32> to vector<128x128xf32>
    %c123_i32 = arith.constant 123 : i32
    %17 = tpu.dynamic_rotate %16 by %c123_i32 dim 0 : vector<128x128xf32>, i32 -> vector<128x128xf32>
    %18 = arith.addf %15, %17 : vector<128x128xf32>
    %19 = vector.shape_cast %18 : vector<128x128xf32> to vector<8x16x128xf32>
    %c0_3 = arith.constant 0 : index
    %c0_4 = arith.constant 0 : index
    %20 = vector.load %arg4[%c0_3, %c0_4] : memref<16x128xf32, #tpu.memory_space<vmem>>, vector<16x128xf32>
    %21 = vector.shape_cast %20 : vector<16x128xf32> to vector<1x16x128xf32>
    %22 = vector.broadcast %21 : vector<1x16x128xf32> to vector<8x16x128xf32>
    %23 = arith.addf %19, %22 : vector<8x16x128xf32>
    %cst_5 = arith.constant dense<0xFF800000> : vector<8x128xf32>
    %24 = vector.multi_reduction <maximumf>, %23, %cst_5 [1] : vector<8x16x128xf32> to vector<8x128xf32>
    %c0_6 = arith.constant 0 : index
    %c0_7 = arith.constant 0 : index
    %25 = vector.load %arg5[%c0_6, %c0_7] : memref<1x128xf32, #tpu.memory_space<vmem>>, vector<1x128xf32>
    %26 = vector.broadcast %25 : vector<1x128xf32> to vector<8x128xf32>
    %27 = arith.addf %24, %26 : vector<8x128xf32>
    %c0_8 = arith.constant 0 : index
    %c0_9 = arith.constant 0 : index
    %28 = vector.load %arg6[%c0_8, %c0_9] : memref<32x128xf32, #tpu.memory_space<vmem>>, vector<32x128xf32>
    %cst_10 = arith.constant dense<0.000000e+00> : vector<32x8xf32>
    %29 = tpu.matmul %28, %27, %cst_10 {dimension_numbers = #tpu.dot_dimension_numbers<[1], [1], [0], [0], [0, 0, 1, 0], [], []>} : vector<32x128xf32>, vector<8x128xf32>, vector<32x8xf32> -> vector<32x8xf32>
    %c0_11 = arith.constant 0 : index
    %c0_12 = arith.constant 0 : index
    %30 = vector.load %arg7[%c0_11, %c0_12] : memref<32x128xf32, #tpu.memory_space<vmem>>, vector<32x128xf32>
    %c0_13 = arith.constant 0 : index
    %c0_14 = arith.constant 0 : index
    %31 = vector.load %arg2[%c0_13, %c0_14] : memref<8x128xf32, #tpu.memory_space<vmem>>, vector<8x128xf32>
    %cst_15 = arith.constant dense<0.000000e+00> : vector<32x8xf32>
    %32 = tpu.matmul %30, %31, %cst_15 {dimension_numbers = #tpu.dot_dimension_numbers<[1], [1], [0], [0], [0, 0, 1, 0], [], []>} : vector<32x128xf32>, vector<8x128xf32>, vector<32x8xf32> -> vector<32x8xf32>
    %33 = arith.addf %29, %32 : vector<32x8xf32>
    %c0_16 = arith.constant 0 : index
    %c0_17 = arith.constant 0 : index
    %34 = vector.load %arg8[%c0_16, %c0_17] : memref<32x1xf32, #tpu.memory_space<vmem>>, vector<32x1xf32>
    %35 = vector.broadcast %34 : vector<32x1xf32> to vector<32x8xf32>
    %36 = arith.addf %33, %35 : vector<32x8xf32>
    %37 = arith.negf %36 : vector<32x8xf32>
    %38 = math.exp %37 : vector<32x8xf32>
    %cst_18 = arith.constant 1.000000e+00 : f32
    %39 = vector.broadcast %cst_18 : f32 to vector<32x8xf32>
    %40 = arith.addf %39, %38 : vector<32x8xf32>
    %41 = arith.divf %39, %40 : vector<32x8xf32>
    %c0_19 = arith.constant 0 : index
    %c0_20 = arith.constant 0 : index
    %42 = vector.load %arg9[%c0_19, %c0_20] : memref<1x32xf32, #tpu.memory_space<vmem>>, vector<1x32xf32>
    %cst_21 = arith.constant dense<0.000000e+00> : vector<1x8xf32>
    %43 = tpu.matmul %42, %41, %cst_21 {dimension_numbers = #tpu.dot_dimension_numbers<[1], [0], [0], [1], [0, 0, 1, 1], [], []>} : vector<1x32xf32>, vector<32x8xf32>, vector<1x8xf32> -> vector<1x8xf32>
    %c0_22 = arith.constant 0 : index
    %c0_23 = arith.constant 0 : index
    %44 = vector.load %arg10[%c0_22, %c0_23] : memref<1x1xf32, #tpu.memory_space<vmem>>, vector<1x1xf32>
    %45 = vector.broadcast %44 : vector<1x1xf32> to vector<1x8xf32>
    %46 = arith.addf %43, %45 : vector<1x8xf32>
    %47 = arith.negf %46 : vector<1x8xf32>
    %48 = math.exp %47 : vector<1x8xf32>
    %cst_24 = arith.constant 1.000000e+00 : f32
    %49 = vector.broadcast %cst_24 : f32 to vector<1x8xf32>
    %50 = arith.addf %49, %48 : vector<1x8xf32>
    %51 = arith.divf %49, %50 : vector<1x8xf32>
    %52 = vector.shape_cast %51 : vector<1x8xf32> to vector<1x1x8xf32>
    %c0_25 = arith.constant 0 : index
    %c0_26 = arith.constant 0 : index
    %c0_27 = arith.constant 0 : index
    %53 = vector.load %arg11[%c0_25, %c0_26, %c0_27] : memref<1x1x8xf32, #tpu.memory_space<vmem>>, vector<1x1x8xf32>
    tpu.vector_store %arg11[%c0_25, %c0_26, %c0_27], %52 {strides = array<i32>} : memref<1x1x8xf32, #tpu.memory_space<vmem>>, vector<1x1x8xf32>,
    return
  }
  func.func @transform_0(%arg0: i32) -> (i32, i32) {
    %c0_i32 = arith.constant 0 : i32
    %c0_i32_0 = arith.constant 0 : i32
    return %arg0, %c0_i32 : i32, i32
  }
  func.func @transform_1(%arg0: i32) -> (i32, i32) {
    %c0_i32 = arith.constant 0 : i32
    %c0_i32_0 = arith.constant 0 : i32
    return %arg0, %c0_i32 : i32, i32
  }
  func.func @transform_2(%arg0: i32) -> (i32, i32) {
    %c0_i32 = arith.constant 0 : i32
    %c0_i32_0 = arith.constant 0 : i32
    %c0_i32_1 = arith.constant 0 : i32
    return %c0_i32, %c0_i32_0 : i32, i32
  }
  func.func @transform_3(%arg0: i32) -> (i32, i32) {
    %c0_i32 = arith.constant 0 : i32
    %c0_i32_0 = arith.constant 0 : i32
    %c0_i32_1 = arith.constant 0 : i32
    return %c0_i32, %c0_i32_0 : i32, i32
  }
  func.func @transform_4(%arg0: i32) -> (i32, i32) {
    %c0_i32 = arith.constant 0 : i32
    %c0_i32_0 = arith.constant 0 : i32
    %c0_i32_1 = arith.constant 0 : i32
    return %c0_i32, %c0_i32_0 : i32, i32
  }
  func.func @transform_5(%arg0: i32) -> (i32, i32) {
    %c0_i32 = arith.constant 0 : i32
    %c0_i32_0 = arith.constant 0 : i32
    %c0_i32_1 = arith.constant 0 : i32
    return %c0_i32, %c0_i32_0 : i32, i32
  }
  func.func @transform_6(%arg0: i32) -> (i32, i32) {
    %c0_i32 = arith.constant 0 : i32
    %c0_i32_0 = arith.constant 0 : i32
    %c0_i32_1 = arith.constant 0 : i32
    return %c0_i32, %c0_i32_0 : i32, i32
  }
  func.func @transform_7(%arg0: i32) -> (i32, i32) {
    %c0_i32 = arith.constant 0 : i32
    %c0_i32_0 = arith.constant 0 : i32
    %c0_i32_1 = arith.constant 0 : i32
    return %c0_i32, %c0_i32_0 : i32, i32
  }
  func.func @transform_8(%arg0: i32) -> (i32, i32) {
    %c0_i32 = arith.constant 0 : i32
    %c0_i32_0 = arith.constant 0 : i32
    %c0_i32_1 = arith.constant 0 : i32
    return %c0_i32, %c0_i32_0 : i32, i32
  }
  func.func @transform_9(%arg0: i32) -> (i32, i32) {
    %c0_i32 = arith.constant 0 : i32
    %c0_i32_0 = arith.constant 0 : i32
    %c0_i32_1 = arith.constant 0 : i32
    return %c0_i32, %c0_i32_0 : i32, i32
  }
  func.func @transform_10(%arg0: i32) -> (i32, i32, i32) {
    %c0_i32 = arith.constant 0 : i32
    %c0_i32_0 = arith.constant 0 : i32
    %c0_i32_1 = arith.constant 0 : i32
    return %arg0, %c0_i32, %c0_i32_0 : i32, i32, i32
  }
}

</mosaic_0001>

<bundles_post_ra>
// kernel: tpu_custom_call.1
= control target key start
LH: loop header
LB: loop body
LE: loop exit
PB: predicated region body
PF: predicated region fallthrough
CT: control target
= control target key end

     0   :  { %s3088_s0 = inlined_call_operand.vmem [shape: f32[256,56], index: 0, kind: input, shape index: {}]   ;;  %s3089_s1 = inlined_call_operand.hbm [shape: f32[16,128], index: 1, kind: input, shape index: {}]   ;;  %s3090_s2 = inlined_call_operand.vmem [shape: f32[56,768], index: 2, kind: input, shape index: {}]   ;;  %s3091_s3 = inlined_call_operand.hbm [shape: f32[16,128], index: 3, kind: input, shape index: {}]   ;;  %s3092_s4 = inlined_call_operand.vmem [shape: f32[1,128], index: 4, kind: input, shape index: {}]   ;;  %s3093_s5 = inlined_call_operand.vmem [shape: f32[32,128], index: 5, kind: input, shape index: {}]   ;;  %s3094_s6 = inlined_call_operand.vmem [shape: f32[32,128], index: 6, kind: input, shape index: {}]   ;;  %s3095_s7 = inlined_call_operand.vmem [shape: f32[32,1], index: 7, kind: input, shape index: {}]   ;;  %s3096_s8 = inlined_call_operand.vmem [shape: f32[1,32], index: 8, kind: input, shape index: {}]   ;;  %s3097_s9 = inlined_call_operand.<no memory space> [shape: f32[1,1], index: 9, kind: input, shape index: {}]   ;;  %s3098_s10 = inlined_call_operand.hbm [shape: f32[2,1,8], index: 10, kind: output, shape index: {}]  }
   0x1   :  { %3106 = sst [smem:[#allocation15_spill]] %s3091_s3  ;;  %v15_v0 = vstv %s3097_s9 }
   0x2   :  { %16 = vst [vmem:[#allocation2] sm:$0x1] %v15_v0 }
   0x3   :  { %17 = vsyncpa [#allocation4], 0 }
   0x4   :  { %19 = vsyncpa [#allocation4 + $0x1], 0 }
   0x5   :  { %20 = vsyncpa [#allocation7], 0 }
   0x6   :  { %21 = vsyncpa [#allocation5], 0 }
   0x7   :  { %23 = vsyncpa [#allocation5 + $0x1], 0  ;;  %s2193_s15 = smov 0   ;;  %s2195_s16 = smov 0  }
   0x8   :  { %s2197_s17 = smov 0   ;;  %s2199_s18 = smov 0  }
   0x9 LB: > { %s2214_s9 = sadd.s32 4294967295, %s2125_s18   ;;  %s1794_s19 = sadd.s32 4294967294, %s2125_s18   ;;  %s2125_s18 = sphi %s2199_s18, %s3126_s18   ;;  %s2121_s17 = sphi %s2197_s17, %s3130_s17   ;;  %s2117_s16 = sphi %s2195_s16, %s3129_s16   ;;  %s2113_s15 = sphi %s2193_s15, %s3128_s15  }
   0xa   : > { %p75_p0 = scmp.ne.s32.totalorder %s2117_s16, %s2113_s15  ;;  %p3102_p1 = scmp.eq.s32.totalorder %s2214_s9, 0 }
   0xb   : > { %p273_p3 = scmp.eq.s32.totalorder %s1794_s19, 1  ;;  %p1795_p5 = scmp.ge.s32.totalorder %s2125_s18, 1 }
   0xc   : > { %p2223_p4 = por %p3102_p1, %p75_p0  ;;  %p280_p7 = scmp.lt.s32.totalorder %s2125_s18, 3 }
   0xd   : > { %p2228_p6 = por %p273_p3, %p75_p0  ;;  %s2127_s23 = smov [#allocation6]  }
   0xe   : > { %s3107_s20 = scalar_select %p2223_p4, 1, 0 }
   0xf   : > { %s3108_s21 = scalar_select %p2228_p6, 1, 0 }
  0x10   : > { %p2233_p8 = pnand %p1795_p5, %p280_p7  ;;  %s295_s24 = sshll.u32 %s2127_s23, 4  ;;  %s296_s24 = int_to_ptr.vmem [resolvable:$true] %s295_s24 }
  0x11   : > { %3109 = sst [smem:[#allocation12_spill]] %s3108_s21  ;;  %s2247_s26 = sadd.s32 1, %s2125_s18  }
  0x12   : > { %s3110_s22 = scalar_select %p2233_p8, 1, 0 }
  0x13   : > { %p1927_p9 = pneg %p2233_p8  ;;  %3112 = sst [smem:[#allocation13_spill]] %s2247_s26 }
  0x14   : > { %s62_s27 = sadd.s32 1, %s2121_s17  ;;  %s59_s28 = ssub.s32 %s2125_s18, %s2247_s26 }
  0x15   : > { %p2242_p11 = pnand %p1927_p9, %p3102_p1  ;;  %s2014_s29 = scalar_lea.vmem %s296_s24, 256 }
  0x16   : > { %p2015_p13 = scmp.ne.s32.totalorder %s296_s24, %s2014_s29  ;;  %p2022_p5 = scmp.lt.s32.totalorder %s296_s24, %s296_s24 }
  0x17   : > { %p2005_p12 = pneg %p2242_p11  ;;  %p2023_p7 = scmp.lt.s32.totalorder %s2014_s29, %s2014_s29 }
  0x19   : > { %p2017_p0 = pnand %p2015_p13, %p2005_p12  ;;  %p2024_p10 = por %p2023_p7, %p2022_p5 }
  0x1b   : > { %p2018_p3 = pneg %p2017_p0 }
  0x1d   : > { %p2025_p2 = pnand %p2024_p10, %p2018_p3 }
  0x1f   : > { %2028 = shalt.err (!%p2025_p2)
}
  0x20   : > { %s2128_s30 = smov 128   ;;  %s2129_s11 = smov 8  }
  0x21   : > { %s3113_s3 = sld [smem:[#allocation15_spill]]  ;;  %p60_p9 = scmp.eq.s32.totalorder %s59_s28, 0 }
  0x22   : > { %p69_p12 = scmp.ne.s32.totalorder %s2121_s17, %s2117_s16  ;;  %p70_p10 = scmp.eq.s32.totalorder %s2125_s18, 0 }
  0x23   : > { %p1940_p2 = scmp.lt.s32.totalorder %s2125_s18, 2  ;;  %p3115_p0 = scmp.eq.s32.totalorder %s2214_s9, 1 }
  0x24   : > { %s2264_s14 = scalar_select %p60_p9, %s2121_s17, %s62_s27  }
  0x25   : > { %p71_p13 = por %p70_p10, %p69_p12  ;;  %p2268_p3 = por %p3115_p0, %p69_p12 }
  0x26   : > { %3114 = sst [smem:[#allocation14_spill]] %s2264_s14  ;;  %s336_s23 = sand.u32 1, %s2121_s17  }
  0x27   : > { %1930 = dma.hbm_to_vmem [thread:$0]  (!%p2242_p11), %s3113_s3, 256, %s296_s24, [#allocation7], %s2128_s30, %s2128_s30, %s2129_s11  }
  0x28   : > { %s3116_s19 = scalar_select %p2268_p3, 1, 0 }
  0x29   : > { %s1799_s29 = sshll.u32 %s2125_s18, 7  ;;  %s1798_s26 = sshll.u32 %s336_s23, 3 }
  0x2a   : > { %s2277_s12 = scalar_lea.hbm %s3089_s1, %s1799_s29  ;;  %s340_s24 = scalar_lea.vmem [#allocation3], %s1798_s26 }
  0x2b   : > { %s347_s27 = sshll.u32 %s340_s24, 4  ;;  %p2279_p11 = pnand %p1940_p2, %p71_p13  ;;  %s348_s27 = int_to_ptr.vmem [resolvable:$true] %s347_s27 }
  0x2c   : > { %s337_s30 = scalar_lea.sflag [#allocation4], %s336_s23  ;;  %s2029_s11 = scalar_lea.hbm %s2277_s12, 128 }
  0x2d   : > { %p2030_p5 = scmp.ne.s32.totalorder %s2277_s12, %s2029_s11  ;;  %p2031_p7 = pneg %p2279_p11 }
  0x2e   : > { %s2034_s29 = scalar_lea.hbm %s3089_s1, 256  ;;  %p2035_p10 = scmp.lt.s32.totalorder %s2277_s12, %s3089_s1 }
  0x2f   : > { %p2032_p9 = pnand %p2031_p7, %p2030_p5  ;;  %p2036_p2 = scmp.lt.s32.totalorder %s2034_s29, %s2029_s11 }
  0x31   : > { %p2033_p12 = pneg %p2032_p9  ;;  %p2037_p13 = por %p2036_p2, %p2035_p10 }
  0x33   : > { %p2038_p0 = pnand %p2037_p13, %p2033_p12 }
  0x35   : > { %2041 = shalt.err (!%p2038_p0)
}
  0x36   : > { %s2042_s24 = scalar_lea.vmem %s348_s27, 128  ;;  %s2130_s23 = smov [#allocation3]  }
  0x37   : > { %p2043_p1 = scmp.ne.s32.totalorder %s348_s27, %s2042_s24  ;;  %s2047_s3 = sshll.u32 %s2130_s23, 4  ;;  %s2048_s3 = int_to_ptr.vmem [resolvable:$false] %s2047_s3 }
  0x38   : > { %s2049_s14 = scalar_lea.vmem %s2048_s3, 256  ;;  %p2050_p5 = scmp.lt.s32.totalorder %s348_s27, %s2048_s3 }
  0x39   : > { %p2045_p6 = pnand %p2043_p1, %p2031_p7  ;;  %p2051_p9 = scmp.lt.s32.totalorder %s2049_s14, %s2042_s24 }
  0x3b   : > { %p2046_p3 = pneg %p2045_p6  ;;  %p2052_p4 = por %p2051_p9, %p2050_p5 }
  0x3d   : > { %p2053_p8 = pnand %p2052_p4, %p2046_p3 }
  0x3f   : > { %2056 = shalt.err (!%p2053_p8)
}
  0x40   : > { %1934 = dma.hbm_to_vmem [thread:$0]  (!%p2279_p11), %s2277_s12, 128, %s348_s27, %s337_s30  }
  0x41   : > { %p3118_p12 = scmp.ne.s32.totalorder %s3110_s22, 0 }
  0x42   : > { %s2300_s11 = sand.u32 (!%p3118_p12), 1, %s2117_s16   ;;  %p3119_p1 = scmp.ne.s32.totalorder (!%p3118_p12), %s3107_s20, 0 }
  0x43   : > { %356 = sbr.rel (%p3118_p12) target bundleno = 901 (0x385), region = 60  ;;  %s1801_s21 = sshll.u32 (!%p3118_p12), %s2300_s11, 3 }
  0x44   : > { %s359_s13 = scalar_lea.sflag (!%p3118_p12), [#allocation4], %s2300_s11  ;;  %s2304_s3 = scalar_lea.vmem (!%p3118_p12), [#allocation3], %s1801_s21 }
  0x48   : > { %2100 = dma.done.wait (%p3119_p1), %s359_s13, 128  }
  0x49   : > { %2102 = vsyncadd (%p3119_p1), %s359_s13, 4294967168  ;;  %p3120_p4 = scmp.eq.s32.totalorder %s2214_s9, 0 }
  0x4b   : > { %2104 = dma.done.wait (%p3120_p4), [#allocation7], 256   ;;  %p3121_p6 = pmov %p3120_p4 }
  0x4c   : > { %v2131_v1 = vmov 0.0   ;;  %s2317_s22 = sshll.u32 %s2214_s9, 4  ;;  %v466_v2 = vld [vmem:[%s3090_s2 + $0x128] sm:$0xff]  ;;  %v465_v3 = vld [vmem:[%s3090_s2 + $0x120] sm:$0xff]  ;;  %v460_v4 = vld [vmem:[%s3090_s2 + $0xf8] sm:$0xff]  ;;  %vm471_vm0 = vcmask 457728  }
  0x4d   : > { %2106 = vsyncadd (%p3121_p6), [#allocation7], 4294967040  ;;  %584 = vmatprep.mubr.f32.mxu0 %v2131_v1  ;;  %650 = vmatprep.mubr.f32.mxu1 %v2131_v1  ;;  %p408_p8 = scmp.lt.s32.totalorder %s2317_s22, 31  ;;  %v459_v5 = vld [vmem:[%s3090_s2 + $0xf0] sm:$0xff]  ;;  %v454_v6 = vld [vmem:[%s3090_s2 + $0xc8] sm:$0xff]  ;;  %vm1442_vm6 = vcmask 1041409   ;;  %s3051_s23 = scalar_lea.hbm %s3098_s10, %s2317_s22 }
  0x4e   : > { %538 = vmatprep.subr.mxu0 %v466_v2  ;;  %1905 = vmatprep.subr.mxu1 %v466_v2  ;;  %v453_v7 = vld [vmem:[%s3090_s2 + $0xc0] sm:$0xff]  ;;  %v448_v8 = vld [vmem:[%s3090_s2 + $0x98] sm:$0xff]  ;;  %v447_v9 = vld [vmem:[%s3090_s2 + $0x90] sm:$0xff]  ;;  %v1019_v2 = vlaneseq  ;;  %vm1445_vm7 = vcmask 1042434   ;;  %vm1448_vm8 = vcmask 1043459   ;;  %vm1451_vm9 = vcmask 1044484  }
  0x4f   : > { %539 = vmatpush1.msra.mxu0 %v465_v3  ;;  %1912 = vmatpush1.msra.mxu1 %v465_v3  ;;  %s409_s24 = scalar_select %p408_p8, %s2317_s22, 31  ;;  %v442_v10 = vld [vmem:[%s3090_s2 + $0x68] sm:$0xff]  ;;  %v441_v11 = vld [vmem:[%s3090_s2 + $0x60] sm:$0xff]  ;;  %v436_v12 = vld [vmem:[%s3090_s2 + $0x38] sm:$0xff]  ;;  %vm1454_vm10 = vcmask 1045509   ;;  %vm1457_vm11 = vcmask 1046534  }
  0x50   : > { %540 = vmatprep.subr.mxu0 %v460_v4  ;;  %1906 = vmatprep.subr.mxu1 %v460_v4  ;;  %v435_v13 = vld [vmem:[%s3090_s2 + $0x30] sm:$0xff]  ;;  %v430_v14 = vld [vmem:[%s3090_s2 + $0x8] sm:$0xff]  ;;  %v429_v15 = vld [vmem:[%s3090_s2] sm:$0xff]  ;;  %vm1460_vm12 = vcmask 1047559   ;;  %vm2133_vm13 = vmmov 0   ;;  %vm1611_vm14 = vcmask 261120  }
  0x51   : > { %541 = vmatpush1.msra.mxu0 %v459_v5  ;;  %1913 = vmatpush1.msra.mxu1 %v459_v5  ;;  %s1804_s30 = sshll.u32 %s409_s24, 3  ;;  %v470_v18 = vld [vmem:[%s3090_s2 + $0x148] sm:$0xff]  ;;  %v468_v19 = vld [vmem:[%s3090_s2 + $0x138] sm:$0xff]  ;;  %v469_v20 = vld [vmem:[%s3090_s2 + $0x140] sm:$0xff]  ;;  %s406_s9 = scalar_lea.vmem [#allocation8], %s2300_s11  ;;  %vm1691_vm15 = vcmask 57344  }
  0x52   : > { %542 = vmatprep.subr.mxu0 %v454_v6  ;;  %1907 = vmatprep.subr.mxu1 %v454_v6  ;;  %s2360_s14 = scalar_lea.vmem %s3088_s0, %s1804_s30  ;;  %v467_v21 = vld [vmem:[%s3090_s2 + $0x130] sm:$0xff]  ;;  %v462_v24 = vld [vmem:[%s3090_s2 + $0x108] sm:$0xff]  ;;  %v464_v25 = vld [vmem:[%s3090_s2 + $0x118] sm:$0xff]  ;;  %s1706_s25 = sshll.u32 %s406_s9, 4  ;;  %s1707_s25 = int_to_ptr.vmem [resolvable:$true] %s1706_s25 }
  0x53   : > { %543 = vmatpush1.msra.mxu0 %v453_v7  ;;  %1914 = vmatpush1.msra.mxu1 %v453_v7  ;;  %v2369_v16 = vld [vmem:[%s2360_s14] sm:$0xff]  ;;  %v2372_v17 = vld [vmem:[%s2360_s14 + $0x58] sm:$0xff]  ;;  %v2393_v22 = vld [vmem:[%s2360_s14 + $0x8] sm:$0xff]  ;;  %v2632_v7 = vshrl.u32 %v1019_v2, 7  ;;  %s1694_s21 = scalar_lea.sflag [#allocation5], %s2300_s11  ;;  %s2057_s13 = scalar_lea.vmem %s1707_s25, 16 }
  0x54   : > { %544 = vmatprep.subr.mxu0 %v448_v8  ;;  %1908 = vmatprep.subr.mxu1 %v448_v8  ;;  %v2396_v23 = vld [vmem:[%s2360_s14 + $0x60] sm:$0xff]  ;;  %v463_v27 = vld [vmem:[%s3090_s2 + $0x110] sm:$0xff]  ;;  %v2420_v29 = vld [vmem:[%s2360_s14 + $0x68] sm:$0xff]  ;;  %p2058_p3 = scmp.ne.s32.totalorder %s1707_s25, %s2057_s13  ;;  %p3122_p11 = scmp.ne.s32.totalorder %s3116_s19, 0 }
  0x55   : > { %545 = vmatpush1.msra.mxu0 %v447_v9  ;;  %1915 = vmatpush1.msra.mxu1 %v447_v9  ;;  %v461_v26 = vld [vmem:[%s3090_s2 + $0x100] sm:$0xff]  ;;  %v2417_v28 = vld [vmem:[%s2360_s14 + $0x10] sm:$0xff]  ;;  %v456_v30 = vld [vmem:[%s3090_s2 + $0xd8] sm:$0xff]  ;;  %vm1021_vm1 = vcmp.lt.s32.totalorder %v2632_v7, 7  ;;  %vm1070_vm2 = vcmp.lt.s32.totalorder %v2632_v7, 6  ;;  %vm1119_vm3 = vcmp.lt.s32.totalorder %v2632_v7, 5 }
  0x56   : > { %546 = vmatprep.subr.mxu0 %v442_v10  ;;  %1909 = vmatprep.subr.mxu1 %v442_v10  ;;  %v455_v31 = vld [vmem:[%s3090_s2 + $0xd0] sm:$0xff]  ;;  %v450_v32 = vld [vmem:[%s3090_s2 + $0xa8] sm:$0xff]  ;;  %v2440_v34 = vld [vmem:[%s2360_s14 + $0x18] sm:$0xff]  ;;  %vm1168_vm4 = vcmp.lt.s32.totalorder %v2632_v7, 4  ;;  %vm1217_vm5 = vcmp.lt.s32.totalorder %v2632_v7, 3  ;;  %p2059_p7 = pnand %p2058_p3, %p3122_p11  ;;  %s2134_s24 = smov [#allocation8]  }
  0x57   : > { %547 = vmatpush1.msra.mxu0 %v441_v11  ;;  %1916 = vmatpush1.msra.mxu1 %v441_v11  ;;  %v458_v33 = vld [vmem:[%s3090_s2 + $0xe8] sm:$0xff]  ;;  %v2443_v35 = vld [vmem:[%s2360_s14 + $0x70] sm:$0xff]  ;;  %v449_v36 = vld [vmem:[%s3090_s2 + $0xa0] sm:$0xff]  ;;  %s2061_s20 = sshll.u32 %s2134_s24, 4  ;;  %s2062_s20 = int_to_ptr.vmem [resolvable:$false] %s2061_s20 }
  0x58   : > { %548 = vmatprep.subr.mxu0 %v436_v12  ;;  %1910 = vmatprep.subr.mxu1 %v436_v12  ;;  %v444_v37 = vld [vmem:[%s3090_s2 + $0x78] sm:$0xff]  ;;  %v443_v38 = vld [vmem:[%s3090_s2 + $0x70] sm:$0xff]  ;;  %v457_v39 = vld [vmem:[%s3090_s2 + $0xe0] sm:$0xff]  ;;  %p2060_p10 = pneg %p2059_p7  ;;  %s2063_s12 = scalar_lea.vmem %s2062_s20, 32 }
  0x59   : > { %549 = vmatpush1.msra.mxu0 %v435_v13  ;;  %1917 = vmatpush1.msra.mxu1 %v435_v13  ;;  %v2464_v40 = vld [vmem:[%s2360_s14 + $0x20] sm:$0xff]  ;;  %v2467_v41 = vld [vmem:[%s2360_s14 + $0x78] sm:$0xff]  ;;  %v438_v42 = vld [vmem:[%s3090_s2 + $0x48] sm:$0xff]  ;;  %p2064_p2 = scmp.lt.s32.totalorder %s1707_s25, %s2062_s20  ;;  %p2065_p13 = scmp.lt.s32.totalorder %s2063_s12, %s2057_s13 }
  0x5a   : > { %550 = vmatprep.subr.mxu0 %v430_v14  ;;  %1911 = vmatprep.subr.mxu1 %v430_v14  ;;  %v437_v43 = vld [vmem:[%s3090_s2 + $0x40] sm:$0xff]  ;;  %v432_v44 = vld [vmem:[%s3090_s2 + $0x18] sm:$0xff]  ;;  %v431_v46 = vld [vmem:[%s3090_s2 + $0x10] sm:$0xff] }
  0x5b   : > { %551 = vmatpush1.msra.mxu0 %v429_v15  ;;  %1918 = vmatpush1.msra.mxu1 %v429_v15  ;;  %v452_v45 = vld [vmem:[%s3090_s2 + $0xb8] sm:$0xff]  ;;  %v2491_v47 = vld [vmem:[%s2360_s14 + $0x28] sm:$0xff]  ;;  %v451_v48 = vld [vmem:[%s3090_s2 + $0xb0] sm:$0xff]  ;;  %p2066_p0 = por %p2065_p13, %p2064_p2 }
  0x5c   : > { %1805 = vmatmul.mubr.msk.f32.vlgmr.msra.gmra.mxu0 %vm471_vm0, %v2369_v16  ;;  %1816 = vmatmul.mubr.msk.f32.vlgmr.msra.gmra.mxu1 %vm471_vm0, %v2372_v17  ;;  %v446_v49 = vld [vmem:[%s3090_s2 + $0x88] sm:$0xff]  ;;  %v419_v50 = vld [vmem:[%s2360_s14 + $0x30] sm:$0xff]  ;;  %v445_v51 = vld [vmem:[%s3090_s2 + $0x80] sm:$0xff] }
  0x5d   : > { %590 = vmatprep.mubr.f32.mxu0 %v2131_v1  ;;  %656 = vmatprep.mubr.f32.mxu1 %v2131_v1  ;;  %v440_v52 = vld [vmem:[%s3090_s2 + $0x58] sm:$0xff]  ;;  %v439_v54 = vld [vmem:[%s3090_s2 + $0x50] sm:$0xff]  ;;  %v434_v55 = vld [vmem:[%s3090_s2 + $0x28] sm:$0xff]  ;;  %p2067_p5 = pnand %p2066_p0, %p2060_p10 }
  0x5e   : > { %860 = vmatprep.subr.mxu0 %v470_v18  ;;  %699 = vmatprep.subr.mxu1 %v468_v19  ;;  %v420_v53 = vld [vmem:[%s2360_s14 + $0x38] sm:$0xff]  ;;  %v421_v56 = vld [vmem:[%s2360_s14 + $0x40] sm:$0xff]  ;;  %v422_v58 = vld [vmem:[%s2360_s14 + $0x48] sm:$0xff] }
  0x5f   : > { %861 = vmatpush1.msra.mxu0 %v469_v20  ;;  %700 = vmatpush1.msra.mxu1 %v467_v21  ;;  %v433_v57 = vld [vmem:[%s3090_s2 + $0x20] sm:$0xff]  ;;  %v423_v59 = vld [vmem:[%s2360_s14 + $0x50] sm:$0xff]  ;;  %v1344_v62 = vld [vmem:[%s3094_s6 + $0x8] sm:$0xff] }
  0x60   : > { %1806 = vmatmul.mubr.msk.f32.gmra.mxu0 %vm471_vm0, %v2393_v22  ;;  %1817 = vmatmul.mubr.msk.f32.gmra.mxu1 %vm471_vm0, %v2396_v23  ;;  %v1347_v60 = vld [vmem:[%s2304_s3] sm:$0xff]  ;;  %v1346_v0 = vld [vmem:[%s3094_s6 + $0x18] sm:$0xff] }
  0x61   : > { %596 = vmatprep.mubr.f32.mxu0 %v2131_v1  ;;  %662 = vmatprep.mubr.f32.mxu1 %v2131_v1  ;;  %v1343_v61 = vld [vmem:[%s3094_s6] sm:$0xff]  ;;  %v1345_v63 = vld [vmem:[%s3094_s6 + $0x10] sm:$0xff] }
  0x62   : > { %701 = vmatprep.subr.mxu1 %v462_v24  ;;  %862 = vmatprep.subr.mxu0 %v464_v25 }
  0x63   : > { %702 = vmatpush1.msra.mxu1 %v461_v26  ;;  %863 = vmatpush1.msra.mxu0 %v463_v27 }
  0x64   : > { %1807 = vmatmul.mubr.msk.f32.gmra.mxu0 %vm471_vm0, %v2417_v28  ;;  %1818 = vmatmul.mubr.msk.f32.gmra.mxu1 %vm471_vm0, %v2420_v29 }
  0x65   : > { %703 = vmatprep.subr.mxu1 %v456_v30  ;;  %602 = vmatprep.mubr.f32.mxu0 %v2131_v1 }
  0x66   : > { %668 = vmatprep.mubr.f32.mxu1 %v2131_v1  ;;  %704 = vmatpush1.msra.mxu1 %v455_v31 }
  0x67   : > { %705 = vmatprep.subr.mxu1 %v450_v32  ;;  %864 = vmatprep.subr.mxu0 %v458_v33 }
  0x68   : > { %1808 = vmatmul.mubr.msk.f32.gmra.mxu0 %vm471_vm0, %v2440_v34  ;;  %1819 = vmatmul.mubr.msk.f32.gmra.mxu1 %vm471_vm0, %v2443_v35 }
  0x69   : > { %706 = vmatpush1.msra.mxu1 %v449_v36  ;;  %608 = vmatprep.mubr.f32.mxu0 %v2131_v1  ;;  %v1549_v36 = vld [vmem:[%s3095_s7 + $0x8] sm:$0xff] }
  0x6a   : > { %707 = vmatprep.subr.mxu1 %v444_v37  ;;  %674 = vmatprep.mubr.f32.mxu1 %v2131_v1 }
  0x6b   : > { %708 = vmatpush1.msra.mxu1 %v443_v38  ;;  %865 = vmatpush1.msra.mxu0 %v457_v39  ;;  %v2132_v39 = vmov 0  }
  0x6c   : > { %1809 = vmatmul.mubr.msk.f32.gmra.mxu0 %vm471_vm0, %v2464_v40  ;;  %1820 = vmatmul.mubr.msk.f32.gmra.mxu1 %vm471_vm0, %v2467_v41 }
  0x6d   : > { %709 = vmatprep.subr.mxu1 %v438_v42  ;;  %614 = vmatprep.mubr.f32.mxu0 %v2131_v1 }
  0x6e   : > { %710 = vmatpush1.msra.mxu1 %v437_v43  ;;  %745 = vmatprep.mubr.f32.mxu1 %v2131_v1 }
  0x6f   : > { %711 = vmatprep.subr.mxu1 %v432_v44  ;;  %866 = vmatprep.subr.mxu0 %v452_v45  ;;  %v1550_v44 = vld [vmem:[%s3095_s7 + $0x10] sm:$0xff]  ;;  %v1548_v45 = vld [vmem:[%s3095_s7] sm:$0xff] }
  0x70   : > { %712 = vmatpush1.msra.mxu1 %v431_v46  ;;  %1810 = vmatmul.mubr.msk.f32.gmra.mxu0 %vm471_vm0, %v2491_v47 }
  0x71   : > { %1821 = vmatmul.mubr.msk.f32.vlgmr.msra.gmra.mxu1 %vm471_vm0, %v2369_v16  ;;  %620 = vmatprep.mubr.f32.mxu0 %v2131_v1 }
  0x72   : > { %751 = vmatprep.mubr.f32.mxu1 %v2131_v1  ;;  %867 = vmatpush1.msra.mxu0 %v451_v48 }
  0x73   : > { %868 = vmatprep.subr.mxu0 %v446_v49  ;;  %1878 = vmatprep.subr.mxu1 %v1347_v60 }
  0x74   : > { %1811 = vmatmul.mubr.msk.f32.gmra.mxu0 %vm471_vm0, %v419_v50  ;;  %1879 = vmatpush3.xpose.msra.mxu1 %v1347_v60 }
  0x75   : > { %1822 = vmatmul.mubr.msk.f32.gmra.mxu1 %vm471_vm0, %v2393_v22  ;;  %626 = vmatprep.mubr.f32.mxu0 %v2131_v1 }
  0x76   : > { %757 = vmatprep.mubr.f32.mxu1 %v2131_v1  ;;  %869 = vmatpush1.msra.mxu0 %v445_v51 }
  0x77   : > { %870 = vmatprep.subr.mxu0 %v440_v52  ;;  %1982 = vset.pattern.permute.xlu1 %v2132_v39 }
  0x78   : > { %1812 = vmatmul.mubr.msk.f32.gmra.mxu0 %vm471_vm0, %v420_v53  ;;  %1981 = vset.pattern.permute.xlu0 %v2132_v39 }
  0x79   : > { %1823 = vmatmul.mubr.msk.f32.gmra.mxu1 %vm471_vm0, %v2417_v28  ;;  %632 = vmatprep.mubr.f32.mxu0 %v2131_v1 }
  0x7a   : > { %763 = vmatprep.mubr.f32.mxu1 %v2131_v1  ;;  %871 = vmatpush1.msra.mxu0 %v439_v54 }
  0x7b   : > { %872 = vmatprep.subr.mxu0 %v434_v55  ;;  %1559 = vperm.xlu1 %1982, %v1549_v36  }
  0x7c   : > { %1813 = vmatmul.mubr.msk.f32.gmra.mxu0 %vm471_vm0, %v421_v56 }
  0x7d   : > { %1824 = vmatmul.mubr.msk.f32.gmra.mxu1 %vm471_vm0, %v2440_v34  ;;  %638 = vmatprep.mubr.f32.mxu0 %v2131_v1 }
  0x7e   : > { %769 = vmatprep.mubr.f32.mxu1 %v2131_v1  ;;  %873 = vmatpush1.msra.mxu0 %v433_v57 }
  0x7f   : > { %1554 = vperm.xlu1 %1982, %v1548_v45  }
  0x80   : > { %1814 = vmatmul.mubr.msk.f32.gmra.mxu0 %vm471_vm0, %v422_v58 }
  0x81   : > { %1825 = vmatmul.mubr.msk.f32.gmra.mxu1 %vm471_vm0, %v2464_v40  ;;  %644 = vmatprep.mubr.f32.mxu0 %v2131_v1 }
  0x82   : > { %775 = vmatprep.mubr.f32.mxu1 %v2131_v1 }
  0x84   : > { %1815 = vmatmul.mubr.msk.f32.gmra.mxu0 %vm471_vm0, %v423_v59 }
  0x85   : > { %1826 = vmatmul.mubr.msk.f32.gmra.mxu1 %vm471_vm0, %v2491_v47  ;;  %906 = vmatprep.mubr.f32.mxu0 %v2131_v1 }
  0x86   : > { %781 = vmatprep.mubr.f32.mxu1 %v2131_v1 }
  0x88   : > { %1837 = vmatmul.mubr.msk.f32.vlgmr.msra.gmra.mxu0 %vm471_vm0, %v2369_v16  ;;  %v1339_v16 = vld [vmem:[%s3093_s5] sm:$0xff] }
  0x89   : > { %1827 = vmatmul.mubr.msk.f32.gmra.mxu1 %vm471_vm0, %v419_v50  ;;  %912 = vmatprep.mubr.f32.mxu0 %v2131_v1 }
  0x8a   : > { %787 = vmatprep.mubr.f32.mxu1 %v2131_v1 }
  0x8c   : > { %1838 = vmatmul.mubr.msk.f32.gmra.mxu0 %vm471_vm0, %v2393_v22 }
  0x8d   : > { %1828 = vmatmul.mubr.msk.f32.gmra.mxu1 %vm471_vm0, %v420_v53  ;;  %918 = vmatprep.mubr.f32.mxu0 %v2131_v1 }
  0x8e   : > { %793 = vmatprep.mubr.f32.mxu1 %v2131_v1 }
  0x90   : > { %1839 = vmatmul.mubr.msk.f32.gmra.mxu0 %vm471_vm0, %v2417_v28 }
  0x91   : > { %1829 = vmatmul.mubr.msk.f32.gmra.mxu1 %vm471_vm0, %v421_v56  ;;  %924 = vmatprep.mubr.f32.mxu0 %v2131_v1 }
  0x92   : > { %799 = vmatprep.mubr.f32.mxu1 %v2131_v1 }
  0x94   : > { %1840 = vmatmul.mubr.msk.f32.gmra.mxu0 %vm471_vm0, %v2440_v34 }
  0x95   : > { %1830 = vmatmul.mubr.msk.f32.gmra.mxu1 %vm471_vm0, %v422_v58  ;;  %930 = vmatprep.mubr.f32.mxu0 %v2131_v1 }
  0x96   : > { %805 = vmatprep.mubr.f32.mxu1 %v2131_v1 }
  0x98   : > { %1841 = vmatmul.mubr.msk.f32.gmra.mxu0 %vm471_vm0, %v2464_v40 }
  0x99   : > { %1831 = vmatmul.mubr.msk.f32.gmra.mxu1 %vm471_vm0, %v423_v59  ;;  %936 = vmatprep.mubr.f32.mxu0 %v2131_v1 }
  0x9a   : > { %811 = vmatprep.mubr.f32.mxu1 %v2131_v1 }
  0x9c   : > { %1842 = vmatmul.mubr.msk.f32.gmra.mxu0 %vm471_vm0, %v2491_v47 }
  0x9d   : > { %1832 = vmatmul.mubr.msk.f32.gmra.mxu1 %vm471_vm0, %v2372_v17  ;;  %942 = vmatprep.mubr.f32.mxu0 %v2131_v1 }
  0x9e   : > { %817 = vmatprep.mubr.f32.mxu1 %v2131_v1 }
  0xa0   : > { %1843 = vmatmul.mubr.msk.f32.gmra.mxu0 %vm471_vm0, %v419_v50 }
  0xa1   : > { %1833 = vmatmul.mubr.msk.f32.gmra.mxu1 %vm471_vm0, %v2396_v23  ;;  %948 = vmatprep.mubr.f32.mxu0 %v2131_v1 }
  0xa2   : > { %823 = vmatprep.mubr.f32.mxu1 %v2131_v1 }
  0xa4   : > { %1844 = vmatmul.mubr.msk.f32.gmra.mxu0 %vm471_vm0, %v420_v53 }
  0xa5   : > { %1834 = vmatmul.mubr.msk.f32.gmra.mxu1 %vm471_vm0, %v2420_v29  ;;  %954 = vmatprep.mubr.f32.mxu0 %v2131_v1 }
  0xa6   : > { %829 = vmatprep.mubr.f32.mxu1 %v2131_v1 }
  0xa8   : > { %1845 = vmatmul.mubr.msk.f32.gmra.mxu0 %vm471_vm0, %v421_v56  ;;  %v1601_v56 = vld [vmem:[#allocation2] sm:$0x1] }
  0xa9   : > { %1835 = vmatmul.mubr.msk.f32.gmra.mxu1 %vm471_vm0, %v2443_v35  ;;  %960 = vmatprep.mubr.f32.mxu0 %v2131_v1 }
  0xaa   : > { %835 = vmatprep.mubr.f32.mxu1 %v2131_v1 }
  0xac   : > { %1846 = vmatmul.mubr.msk.f32.gmra.mxu0 %vm471_vm0, %v422_v58 }
  0xad   : > { %1836 = vmatmul.mubr.msk.f32.gmra.mxu1 %vm471_vm0, %v2467_v41  ;;  %966 = vmatprep.mubr.f32.mxu0 %v2131_v1 }
  0xae   : > { %1880 = vmatprep.mubr.f32.mxu1 %v1343_v61 }
  0xb0   : > { %1847 = vmatmul.mubr.msk.f32.gmra.mxu0 %vm471_vm0, %v423_v59 }
  0xb1   : > { %972 = vmatprep.mubr.f32.mxu0 %v2131_v1  ;;  %1881 = vmatmul.mubr.f32.vlgmr.msra.gmra.mxu1 %v1344_v62 }
  0xb2   : > { %1883 = vmatprep.mubr.f32.mxu1 %v1345_v63 }
  0xb4   : > { %1848 = vmatmul.mubr.msk.f32.gmra.mxu0 %vm471_vm0, %v2372_v17 }
  0xb5   : > { %978 = vmatprep.mubr.f32.mxu0 %v2131_v1  ;;  %1884 = vmatmul.mubr.f32.gmra.mxu1 %v1346_v0 }
  0xb6   : > { %1888 = vmatprep.mubr.f32.mxu1 %v1339_v16 }
  0xb8   : > { %1849 = vmatmul.mubr.msk.f32.gmra.mxu0 %vm471_vm0, %v2396_v23 }
  0xb9   : > { %984 = vmatprep.mubr.f32.mxu0 %v2131_v1 }
  0xbc   : > { %1850 = vmatmul.mubr.msk.f32.gmra.mxu0 %vm471_vm0, %v2420_v29 }
  0xbd   : > { %990 = vmatprep.mubr.f32.mxu0 %v2131_v1 }
  0xc0   : > { %1851 = vmatmul.mubr.msk.f32.gmra.mxu0 %vm471_vm0, %v2443_v35  ;;  %v1551_v35 = vld [vmem:[%s3095_s7 + $0x18] sm:$0xff] }
  0xc1   : > { %996 = vmatprep.mubr.f32.mxu0 %v2131_v1  ;;  %1569 = vperm.xlu0 %1981, %v1551_v35  }
  0xc4   : > { %1852 = vmatmul.mubr.msk.f32.gmra.mxu0 %vm471_vm0, %v2467_v41 }
  0xc5   : > { %1564 = vperm.xlu0 %1981, %v1550_v44  }
  0xc9   : > { %1604 = vperm.xlu0 %1981, %v1601_v56  }
 0x11c   : > { %v586_v3 = vpop.f32.mrf.mxu0  ;;  %v652_v4 = vpop.f32.mrf.mxu1 }
 0x11e   : > { %v588_v5 = vpop.f32.mrf.mxu0  ;;  %v2630_v6 = vpop.f32.mrf.mxu1 }
 0x11f   : > { %v1014_v10 = vrot.slane %v2630_v6, 1  ;;  %v1003_v13 = vrot.slane %v588_v5, 1 }
 0x120   : > { %v592_v8 = vpop.f32.mrf.mxu0  ;;  %v658_v9 = vpop.f32.mrf.mxu1 }
 0x122   : > { %v594_v11 = vpop.f32.mrf.mxu0  ;;  %v660_v12 = vpop.f32.mrf.mxu1 }
 0x123   : > { %v1004_v14 = vrot.slane %v594_v11, 1  ;;  %v1015_v15 = vrot.slane %v660_v12, 1 }
 0x124   : > { %v598_v17 = vpop.f32.mrf.mxu0  ;;  %v664_v18 = vpop.f32.mrf.mxu1 }
 0x125   : > { %v1036_v19 = vsel %vm1021_vm1, %v1003_v13, %v1004_v14  ;;  %v1025_v20 = vsel %vm1021_vm1, %v1014_v10, %v1015_v15 }
 0x126   : > { %v2645_v21 = vadd.f32 %v1036_v19, %v586_v3  ;;  %v2647_v22 = vadd.f32 %v1025_v20, %v652_v4  ;;  %v600_v23 = vpop.f32.mrf.mxu0  ;;  %v666_v24 = vpop.f32.mrf.mxu1 }
 0x127   : > { %v1005_v25 = vrot.slane %v600_v23, 1  ;;  %v1016_v26 = vrot.slane %v666_v24, 1 }
 0x128   : > { %v604_v27 = vpop.f32.mrf.mxu0  ;;  %v2649_v28 = vpop.f32.mrf.mxu1 }
 0x129   : > { %v1035_v29 = vsel %vm1021_vm1, %v1004_v14, %v1005_v25  ;;  %v1024_v30 = vsel %vm1021_vm1, %v1015_v15, %v1016_v26 }
 0x12a   : > { %v2655_v31 = vadd.f32 %v1035_v29, %v592_v8  ;;  %v2657_v32 = vadd.f32 %v1024_v30, %v658_v9  ;;  %v606_v33 = vpop.f32.mrf.mxu0  ;;  %v2659_v34 = vpop.f32.mrf.mxu1 }
 0x12b   : > { %v1006_v37 = vrot.slane %v606_v33, 1  ;;  %v1017_v38 = vrot.slane %v2659_v34, 1 }
 0x12c   : > { %v610_v40 = vpop.f32.mrf.mxu0  ;;  %v676_v41 = vpop.f32.mrf.mxu1 }
 0x12d   : > { %v1034_v42 = vsel %vm1021_vm1, %v1005_v25, %v1006_v37  ;;  %v1023_v43 = vsel %vm1021_vm1, %v1016_v26, %v1017_v38 }
 0x12e   : > { %v2680_v46 = vadd.f32 %v1034_v42, %v598_v17  ;;  %v2682_v47 = vadd.f32 %v1023_v43, %v664_v18  ;;  %v612_v48 = vpop.f32.mrf.mxu0  ;;  %v2684_v49 = vpop.f32.mrf.mxu1 }
 0x12f   : > { %v1007_v50 = vrot.slane %v612_v48, 1  ;;  %v1018_v51 = vrot.slane %v2684_v49, 1 }
 0x130   : > { %v616_v52 = vpop.f32.mrf.mxu0 }
 0x131   : > { %v1033_v53 = vsel %vm1021_vm1, %v1006_v37, %v1007_v50  ;;  %v1037_v54 = vsel %vm1021_vm1, %v1018_v51, %v1003_v13  ;;  %v2693_v55 = vpop.f32.mrf.mxu1 }
 0x132   : > { %v2695_v57 = vadd.f32 %v1033_v53, %v604_v27  ;;  %v2697_v58 = vadd.f32 %v1037_v54, %v676_v41  ;;  %v618_v59 = vpop.f32.mrf.mxu0  ;;  %v1054_v33 = vrot.slane %v2693_v55, 2 }
 0x133   : > { %v1008_v60 = vrot.slane %v618_v59, 1  ;;  %v2699_v61 = vpop.f32.mrf.mxu1 }
 0x134   : > { %v622_v62 = vpop.f32.mrf.mxu0  ;;  %v1103_v43 = vrot.slane %v2699_v61, 3 }
 0x135   : > { %v1032_v63 = vsel %vm1021_vm1, %v1007_v50, %v1008_v60  ;;  %v753_v0 = vpop.f32.mrf.mxu1 }
 0x136   : > { %v2703_v2 = vadd.f32 %v1032_v63, %v610_v40  ;;  %v624_v3 = vpop.f32.mrf.mxu0  ;;  %v1055_v35 = vrot.slane %v753_v0, 2  ;;  %v1022_v0 = vsel %vm1021_vm1, %v1017_v38, %v1018_v51 }
 0x137   : > { %v1009_v4 = vrot.slane %v624_v3, 1  ;;  %v755_v5 = vpop.f32.mrf.mxu1 }
 0x138   : > { %v628_v8 = vpop.f32.mrf.mxu0  ;;  %v1085_v44 = vsel %vm1070_vm2, %v1054_v33, %v1055_v35  ;;  %v1104_v45 = vrot.slane %v755_v5, 3 }
 0x139   : > { %v1031_v9 = vsel %vm1021_vm1, %v1008_v60, %v1009_v4  ;;  %v759_v11 = vpop.f32.mrf.mxu1 }
 0x13a   : > { %v2707_v12 = vadd.f32 %v1031_v9, %v616_v52  ;;  %v630_v13 = vpop.f32.mrf.mxu0  ;;  %v1056_v37 = vrot.slane %v759_v11, 2  ;;  %v1134_v3 = vsel %vm1119_vm3, %v1103_v43, %v1104_v45 }
 0x13b   : > { %v1010_v14 = vrot.slane %v630_v13, 1  ;;  %v761_v15 = vpop.f32.mrf.mxu1 }
 0x13c   : > { %v2709_v16 = vpop.f32.mrf.mxu0  ;;  %v1084_v50 = vsel %vm1070_vm2, %v1055_v35, %v1056_v37  ;;  %v1105_v52 = vrot.slane %v761_v15, 3 }
 0x13d   : > { %v1030_v17 = vsel %vm1021_vm1, %v1009_v4, %v1010_v14  ;;  %v765_v18 = vpop.f32.mrf.mxu1  ;;  %v1088_v4 = vadd.f32 %v1084_v50, %v2655_v31 }
 0x13e   : > { %v2713_v19 = vadd.f32 %v1030_v17, %v622_v62  ;;  %v2715_v20 = vpop.f32.mrf.mxu0  ;;  %v1057_v40 = vrot.slane %v765_v18, 2  ;;  %v1087_v62 = vadd.f32 %v1085_v44, %v2645_v21  ;;  %v1133_v21 = vsel %vm1119_vm3, %v1104_v45, %v1105_v52 }
 0x13f   : > { %v1011_v23 = vrot.slane %v2715_v20, 1  ;;  %v2718_v24 = vpop.f32.mrf.mxu1  ;;  %v2789_v20 = vadd.f32 %v1022_v0, %v2649_v28  ;;  %v1137_v35 = vadd.f32 %v1133_v21, %v1088_v4 }
 0x140   : > { %v2720_v25 = vpop.f32.mrf.mxu0  ;;  %v1106_v53 = vrot.slane %v2718_v24, 3  ;;  %v1083_v56 = vsel %vm1070_vm2, %v1056_v37, %v1057_v40 }
 0x141   : > { %v1029_v26 = vsel %vm1021_vm1, %v1010_v14, %v1011_v23  ;;  %v2724_v27 = vpop.f32.mrf.mxu1  ;;  %v1089_v49 = vadd.f32 %v1083_v56, %v2680_v46  ;;  %v1136_v14 = vadd.f32 %v1134_v3, %v1087_v62 }
 0x142   : > { %v2726_v29 = vadd.f32 %v1029_v26, %v628_v8  ;;  %v2728_v30 = vpop.f32.mrf.mxu0  ;;  %v1058_v59 = vrot.slane %v2724_v27, 2  ;;  %v1132_v34 = vsel %vm1119_vm3, %v1105_v52, %v1106_v53 }
 0x143   : > { %v2731_v36 = vpop.f32.mrf.mxu1  ;;  %v1012_v38 = vrot.slane %v2728_v30, 1 }
 0x144   : > { %v2734_v39 = vpop.f32.mrf.mxu0  ;;  %v1082_v8 = vsel %vm1070_vm2, %v1057_v40, %v1058_v59  ;;  %v1107_v31 = vrot.slane %v2731_v36, 3  ;;  %v1138_v36 = vadd.f32 %v1132_v34, %v1089_v49 }
 0x145   : > { %v777_v41 = vpop.f32.mrf.mxu1  ;;  %v1090_v37 = vadd.f32 %v1082_v8, %v2695_v57  ;;  %v1028_v28 = vsel %vm1021_vm1, %v1011_v23, %v1012_v38 }
 0x146   : > { %v2736_v42 = vpop.f32.mrf.mxu0  ;;  %v1059_v15 = vrot.slane %v777_v41, 2 }
 0x147   : > { %v2743_v48 = vpop.f32.mrf.mxu1  ;;  %v1013_v46 = vrot.slane %v2736_v42, 1  ;;  %v1131_v42 = vsel %vm1119_vm3, %v1106_v53, %v1107_v31 }
 0x148   : > { %v2749_v54 = vpop.f32.mrf.mxu0  ;;  %v1081_v52 = vsel %vm1070_vm2, %v1058_v59, %v1059_v15  ;;  %v1108_v56 = vrot.slane %v2743_v48, 3  ;;  %v2823_v59 = vadd.f32 %v1028_v28, %v2709_v16  ;;  %v1139_v21 = vadd.f32 %v1131_v42, %v1090_v37 }
 0x149   : > { %v2754_v60 = vpop.f32.mrf.mxu1  ;;  %v1152_v9 = vrot.slane %v2749_v54, 4  ;;  %v1027_v57 = vsel %vm1021_vm1, %v1012_v38, %v1013_v46  ;;  %v1091_v38 = vadd.f32 %v1081_v52, %v2703_v2 }
 0x14a   : > { %v2757_v63 = vpop.f32.mrf.mxu0  ;;  %v1060_v17 = vrot.slane %v2754_v60, 2  ;;  %v1130_v2 = vsel %vm1119_vm3, %v1107_v31, %v1108_v56 }
 0x14b   : > { %v2771_v5 = vpop.f32.mrf.mxu1  ;;  %v1201_v24 = vrot.slane %v2757_v63, 5 }
 0x14c   : > { %v914_v51 = vpop.f32.mrf.mxu0  ;;  %v1080_v23 = vsel %vm1070_vm2, %v1059_v15, %v1060_v17  ;;  %v1109_v60 = vrot.slane %v2771_v5, 3  ;;  %v1026_v5 = vsel %vm1021_vm1, %v1013_v46, %v1014_v10 }
 0x14d   : > { %v2784_v11 = vpop.f32.mrf.mxu1  ;;  %v1153_v13 = vrot.slane %v914_v51, 4  ;;  %v2830_v51 = vld [vmem:[#allocation6] sm:$0xff]  ;;  %v1092_v6 = vadd.f32 %v1080_v23, %v2707_v12 }
 0x14e   : > { %v916_v18 = vpop.f32.mrf.mxu0  ;;  %v1061_v62 = vrot.slane %v2784_v11, 2  ;;  %v2834_v11 = vld [vmem:[#allocation6 + $0x8] sm:$0xff]  ;;  %v1129_v10 = vsel %vm1119_vm3, %v1108_v56, %v1109_v60 }
 0x14f   : > { %v1183_v26 = vsel %vm1168_vm4, %v1152_v9, %v1153_v13  ;;  %v2796_v27 = vpop.f32.mrf.mxu1  ;;  %v1202_v30 = vrot.slane %v916_v18, 5  ;;  %v1141_v52 = vadd.f32 %v1129_v10, %v1092_v6 }
 0x150   : > { %v1185_v40 = vadd.f32 %v1183_v26, %v1136_v14  ;;  %v920_v41 = vpop.f32.mrf.mxu0  ;;  %v2837_v14 = vadd.f32 %v1027_v57, %v2720_v25  ;;  %v1079_v46 = vsel %vm1070_vm2, %v1060_v17, %v1061_v62  ;;  %v1110_v25 = vrot.slane %v2796_v27, 3 }
 0x151   : > { %v1232_v44 = vsel %vm1217_vm5, %v1201_v24, %v1202_v30  ;;  %v2807_v45 = vpop.f32.mrf.mxu1  ;;  %v1154_v50 = vrot.slane %v920_v41, 4  ;;  %v2852_v41 = vadd.f32 %v1026_v5, %v2734_v39  ;;  %v1093_v23 = vadd.f32 %v1079_v46, %v2713_v19 }
 0x152   : > { %v922_v53 = vpop.f32.mrf.mxu0  ;;  %v1234_v49 = vadd.f32 %v1232_v44, %v1185_v40  ;;  %v1062_v28 = vrot.slane %v2807_v45, 2  ;;  %v1128_v45 = vsel %vm1119_vm3, %v1109_v60, %v1110_v25 }
 0x153   : > { %v1182_v0 = vsel %vm1168_vm4, %v1153_v13, %v1154_v50  ;;  %v2820_v3 = vpop.f32.mrf.mxu1  ;;  %v1203_v4 = vrot.slane %v922_v53, 5 }
 0x154   : > { %v1186_v48 = vadd.f32 %v1182_v0, %v1137_v35  ;;  %v926_v34 = vpop.f32.mrf.mxu0  ;;  %v1252_v37 = vadd.f32 %v2830_v51, %v1234_v49  ;;  %v1111_v5 = vrot.slane %v2820_v3, 3 }
 0x155   : > { %v1231_v8 = vsel %vm1217_vm5, %v1202_v30, %v1203_v4  ;;  %v801_v16 = vpop.f32.mrf.mxu1  ;;  %v1155_v13 = vrot.slane %v926_v34, 4 }
 0x156   : > { %v1235_v15 = vadd.f32 %v1231_v8, %v1186_v48  ;;  %v928_v18 = vpop.f32.mrf.mxu0  ;;  %v1063_v27 = vrot.slane %v801_v16, 2 }
 0x157   : > { %v1181_v26 = vsel %vm1168_vm4, %v1154_v50, %v1155_v13  ;;  %v803_v30 = vpop.f32.mrf.mxu1  ;;  %v1204_v35 = vrot.slane %v928_v18, 5  ;;  %v1140_v50 = vadd.f32 %v1130_v2, %v1091_v38  ;;  %v1078_v38 = vsel %vm1070_vm2, %v1061_v62, %v1062_v28 }
 0x158   : > { %v1253_v31 = vadd.f32 %v2834_v11, %v1235_v15  ;;  %v1187_v12 = vadd.f32 %v1181_v26, %v1138_v36  ;;  %v932_v40 = vpop.f32.mrf.mxu0  ;;  %v1077_v2 = vsel %vm1070_vm2, %v1062_v28, %v1063_v27  ;;  %v1112_v6 = vrot.slane %v803_v30, 3 }
 0x159   : > { %v1230_v17 = vsel %vm1217_vm5, %v1203_v4, %v1204_v35  ;;  %v807_v42 = vpop.f32.mrf.mxu1  ;;  %v1156_v44 = vrot.slane %v932_v40, 4  ;;  %v1127_v40 = vsel %vm1119_vm3, %v1110_v25, %v1111_v5  ;;  %v1095_v28 = vadd.f32 %v1077_v2, %v2823_v59 }
 0x15a   : > { %v1268_v57 = vmax.f32 %v1252_v37, %v1253_v31  ;;  %v934_v56 = vpop.f32.mrf.mxu0  ;;  %v1236_v53 = vadd.f32 %v1230_v17, %v1187_v12  ;;  %v1064_v49 = vrot.slane %v807_v42, 2  ;;  %v1142_v31 = vadd.f32 %v1128_v45, %v1093_v23 }
 0x15b   : > { %v1180_v36 = vsel %vm1168_vm4, %v1155_v13, %v1156_v44  ;;  %v2860_v39 = vpop.f32.mrf.mxu1  ;;  %v1205_v0 = vrot.slane %v934_v56, 5  ;;  %v1094_v12 = vadd.f32 %v1078_v38, %v2726_v29  ;;  %v1126_v42 = vsel %vm1119_vm3, %v1111_v5, %v1112_v6 }
 0x15c   : > { %v1269_v4 = vrot.slane %v1268_v57, 4  ;;  %v1188_v48 = vadd.f32 %v1180_v36, %v1139_v21  ;;  %v938_v34 = vpop.f32.mrf.mxu0  ;;  %v1254_v21 = vadd.f32 %v2830_v51, %v1236_v53  ;;  %v1113_v18 = vrot.slane %v2860_v39, 3 }
 0x15d   : > { %v1229_v19 = vsel %vm1217_vm5, %v1204_v35, %v1205_v0  ;;  %v813_v8 = vpop.f32.mrf.mxu1  ;;  %v1157_v16 = vrot.slane %v938_v34, 4  ;;  %v1076_v26 = vsel %vm1070_vm2, %v1063_v27, %v1064_v49  ;;  %v2896_v34 = vadd.f32 %v1126_v42, %v1095_v28 }
 0x15e   : > { %v1270_v13 = vmax.f32 %v1268_v57, %v1269_v4  ;;  %v1237_v60 = vadd.f32 %v1229_v19, %v1188_v48  ;;  %v940_v15 = vpop.f32.mrf.mxu0  ;;  %v1065_v37 = vrot.slane %v813_v8, 2  ;;  %v1096_v53 = vadd.f32 %v1076_v26, %v2837_v14 }
 0x15f   : > { %v1179_v62 = vsel %vm1168_vm4, %v1156_v44, %v1157_v16  ;;  %v2875_v3 = vpop.f32.mrf.mxu1  ;;  %v1206_v10 = vrot.slane %v940_v15, 5  ;;  %v1125_v23 = vsel %vm1119_vm3, %v1112_v6, %v1113_v18  ;;  %v1143_v48 = vadd.f32 %v1127_v40, %v1094_v12 }
 0x160   : > { %v1271_v46 = vrot.slane %v1270_v13, 2  ;;  %v1255_v35 = vadd.f32 %v2834_v11, %v1237_v60  ;;  %v944_v30 = vpop.f32.mrf.mxu0  ;;  %v1189_v57 = vadd.f32 %v1179_v62, %v1140_v50  ;;  %v1075_v45 = vsel %vm1070_vm2, %v1064_v49, %v1065_v37 }
 0x161   : > { %v819_v17 = vpop.f32.mrf.mxu1  ;;  %v1158_v56 = vrot.slane %v944_v30, 4  ;;  %v1228_v29 = vsel %vm1217_vm5, %v1205_v0, %v1206_v10  ;;  %v1114_v50 = vrot.slane %v2875_v3, 3  ;;  %v2902_v6 = vadd.f32 %v1125_v23, %v1096_v53 }
 0x162   : > { %v1275_v44 = vmax.f32 %v1254_v21, %v1255_v35  ;;  %v946_v27 = vpop.f32.mrf.mxu0  ;;  %v1272_v59 = vmax.f32 %v1270_v13, %v1271_v46  ;;  %v1066_v14 = vrot.slane %v819_v17, 2  ;;  %v1238_v19 = vadd.f32 %v1228_v29, %v1189_v57 }
 0x163   : > { %v2891_v36 = vpop.f32.mrf.mxu1  ;;  %v1207_v25 = vrot.slane %v946_v27, 5  ;;  %v1178_v38 = vsel %vm1168_vm4, %v1157_v16, %v1158_v56  ;;  %v1097_v49 = vadd.f32 %v1075_v45, %v2852_v41  ;;  %v1124_v16 = vsel %vm1119_vm3, %v1113_v18, %v1114_v50 }
 0x164   : > { %v1276_v39 = vrot.slane %v1275_v44, 4  ;;  %v950_v4 = vpop.f32.mrf.mxu0  ;;  %v1190_v8 = vadd.f32 %v1178_v38, %v1141_v52  ;;  %v1273_v62 = vrot.slane %v1272_v59, 1  ;;  %v1074_v52 = vsel %vm1070_vm2, %v1065_v37, %v1066_v14 }
 0x165   : > { %v825_v5 = vpop.f32.mrf.mxu1  ;;  %v1227_v13 = vsel %vm1217_vm5, %v1206_v10, %v1207_v25  ;;  %v1159_v60 = vrot.slane %v950_v4, 4  ;;  %v1115_v10 = vrot.slane %v2891_v36, 3  ;;  %v1256_v40 = vadd.f32 %v2830_v51, %v1238_v19 }
 0x166   : > { %v1277_v0 = vmax.f32 %v1275_v44, %v1276_v39  ;;  %v952_v2 = vpop.f32.mrf.mxu0  ;;  %v1239_v46 = vadd.f32 %v1227_v13, %v1190_v8  ;;  %v1067_v35 = vrot.slane %v825_v5, 2  ;;  %v1274_v27 = vmax.f32 %v1272_v59, %v1273_v62  ;;  %v2931_v59 = vld [vmem:[%s3092_s4] ss:$0 sm:$0xff] }
 0x167   : > { %v827_v15 = vpop.f32.mrf.mxu1  ;;  %v1208_v21 = vrot.slane %v952_v2, 5  ;;  %v1177_v30 = vsel %vm1168_vm4, %v1158_v56, %v1159_v60  ;;  %v1098_v56 = vadd.f32 %v1074_v52, %v2647_v22  ;;  %v1146_v2 = vadd.f32 %v1124_v16, %v1097_v49 }
 0x168   : > { %v1278_v3 = vrot.slane %v1277_v0, 2  ;;  %v956_v26 = vpop.f32.mrf.mxu0  ;;  %v1257_v28 = vadd.f32 %v2834_v11, %v1239_v46  ;;  %v1191_v17 = vadd.f32 %v1177_v30, %v1142_v31  ;;  %v1123_v31 = vsel %vm1119_vm3, %v1114_v50, %v1115_v10 }
 0x169   : > { %v2912_v41 = vpop.f32.mrf.mxu1  ;;  %v1226_v42 = vsel %vm1217_vm5, %v1207_v25, %v1208_v21  ;;  %v1160_v44 = vrot.slane %v956_v26, 4  ;;  %v1073_v39 = vsel %vm1070_vm2, %v1066_v14, %v1067_v35  ;;  %v1116_v25 = vrot.slane %v827_v15, 3 }
 0x16a   : > { %v1279_v12 = vmax.f32 %v1277_v0, %v1278_v3  ;;  %v958_v18 = vpop.f32.mrf.mxu0  ;;  %v1068_v37 = vrot.slane %v2912_v41, 2  ;;  %v1282_v23 = vmax.f32 %v1256_v40, %v1257_v28  ;;  %v1240_v38 = vadd.f32 %v1226_v42, %v1191_v17 }
 0x16b   : > { %v1209_v57 = vrot.slane %v958_v18, 5  ;;  %v2920_v29 = vpop.f32.mrf.mxu1  ;;  %v1176_v45 = vsel %vm1168_vm4, %v1159_v60, %v1160_v44  ;;  %v1099_v15 = vadd.f32 %v1073_v39, %v2657_v32  ;;  %v1331_v3 = vadd.f32 %v2931_v59, %v1274_v27 }
 0x16c   : > { %v1280_v53 = vrot.slane %v1279_v12, 1  ;;  %v962_v36 = vpop.f32.mrf.mxu0  ;;  %v1283_v4 = vrot.slane %v1282_v23, 4  ;;  %v1072_v50 = vsel %vm1070_vm2, %v1067_v35, %v1068_v37  ;;  %v1192_v14 = vadd.f32 %v1176_v45, %v1143_v48 }
 0x16d   : > { %v1225_v5 = vsel %vm1217_vm5, %v1208_v21, %v1209_v57  ;;  %v1117_v19 = vrot.slane %v2920_v29, 3  ;;  %v1161_v8 = vrot.slane %v962_v36, 4  ;;  %v1122_v21 = vsel %vm1119_vm3, %v1115_v10, %v1116_v25  ;;  %v837_v26 = vpop.f32.mrf.mxu1 }
 0x16e   : > { %v1281_v22 = vmax.f32 %v1279_v12, %v1280_v53  ;;  %v964_v0 = vpop.f32.mrf.mxu0  ;;  %v1284_v60 = vmax.f32 %v1282_v23, %v1283_v4  ;;  %v1241_v46 = vadd.f32 %v1225_v5, %v1192_v14  ;;  %v1147_v35 = vadd.f32 %v1123_v31, %v1098_v56 }
 0x16f   : > { %v1175_v48 = vsel %vm1168_vm4, %v1160_v44, %v1161_v8  ;;  %v1100_v12 = vadd.f32 %v1072_v50, %v2682_v47  ;;  %v1258_v16 = vadd.f32 %v2830_v51, %v1240_v38  ;;  %v1121_v32 = vsel %vm1119_vm3, %v1116_v25, %v1117_v19 }
 0x170   : > { %v1332_v13 = vadd.f32 %v2931_v59, %v1281_v22  ;;  %v968_v62 = vpop.f32.mrf.mxu0  ;;  %v1285_v30 = vrot.slane %v1284_v60, 2  ;;  %v1259_v10 = vadd.f32 %v2834_v11, %v1241_v46  ;;  %v1193_v40 = vadd.f32 %v1175_v48, %v2896_v34 }
 0x171   : > { %v1148_v17 = vadd.f32 %v1122_v21, %v1099_v15  ;;  %v1069_v18 = vrot.slane %v837_v26, 2  ;;  %v1210_v42 = vrot.slane %v964_v0, 5  ;;  %v1162_v47 = vrot.slane %v968_v62, 4  ;;  %v839_v62 = vpop.f32.mrf.mxu1 }
 0x172   : > { %v1441_v52 = vrot.slane %v1332_v13, 7  ;;  %v970_v49 = vpop.f32.mrf.mxu0  ;;  %v1286_v28 = vmax.f32 %v1284_v60, %v1285_v30  ;;  %v1289_v27 = vmax.f32 %v1258_v16, %v1259_v10  ;;  %v2955_v36 = vadd.f32 %v1121_v32, %v1100_v12 }
 0x173   : > { %v1211_v53 = vrot.slane %v970_v49, 5  ;;  %v1224_v31 = vsel %vm1217_vm5, %v1209_v57, %v1210_v42  ;;  %v1174_v22 = vsel %vm1168_vm4, %v1161_v8, %v1162_v47  ;;  %v1071_v13 = vsel %vm1070_vm2, %v1068_v37, %v1069_v18 }
 0x174   : > { %v974_v44 = vpop.f32.mrf.mxu0  ;;  %v1287_v23 = vrot.slane %v1286_v28, 1  ;;  %v1443_v25 = vsel %vm1442_vm6, %v1441_v52, %v1331_v3  ;;  %v1290_v34 = vrot.slane %v1289_v27, 4  ;;  %v1242_v45 = vadd.f32 %v1224_v31, %v1193_v40 }
 0x175   : > { %v1163_v56 = vrot.slane %v974_v44, 4  ;;  %v1223_v4 = vsel %vm1217_vm5, %v1210_v42, %v1211_v53  ;;  %v1194_v5 = vadd.f32 %v1174_v22, %v2902_v6  ;;  %v1086_v8 = vsel %vm1070_vm2, %v1069_v18, %v1054_v33 }
 0x176   : > { %v976_v39 = vpop.f32.mrf.mxu0  ;;  %v1288_v38 = vmax.f32 %v1286_v28, %v1287_v23  ;;  %v1291_v57 = vmax.f32 %v1289_v27, %v1290_v34  ;;  %v1260_v41 = vadd.f32 %v2830_v51, %v1242_v45  ;;  %v1118_v49 = vrot.slane %v839_v62, 3 }
 0x177   : > { %v1173_v0 = vsel %vm1168_vm4, %v1162_v47, %v1163_v56  ;;  %v1212_v50 = vrot.slane %v976_v39, 5  ;;  %v1243_v6 = vadd.f32 %v1223_v4, %v1194_v5  ;;  %v1101_v10 = vadd.f32 %v1071_v13, %v2789_v20 }
 0x178   : > { %v980_v14 = vpop.f32.mrf.mxu0  ;;  %v1195_v60 = vadd.f32 %v1173_v0, %v1146_v2  ;;  %v1333_v46 = vadd.f32 %v2931_v59, %v1288_v38  ;;  %v1292_v26 = vrot.slane %v1291_v57, 2  ;;  %v1102_v27 = vadd.f32 %v1086_v8, %v2697_v58 }
 0x179   : > { %v1164_v15 = vrot.slane %v980_v14, 4  ;;  %v1222_v3 = vsel %vm1217_vm5, %v1211_v53, %v1212_v50  ;;  %v1261_v55 = vadd.f32 %v2834_v11, %v1243_v6  ;;  %v1135_v45 = vsel %vm1119_vm3, %v1118_v49, %v1103_v43 }
 0x17a   : > { %v982_v21 = vpop.f32.mrf.mxu0  ;;  %v1244_v48 = vadd.f32 %v1222_v3, %v1195_v60  ;;  %v1444_v30 = vrot.slane %v1333_v46, 6  ;;  %v1293_v12 = vmax.f32 %v1291_v57, %v1292_v26  ;;  %v1151_v13 = vadd.f32 %v1135_v45, %v1102_v27 }
 0x17b   : > { %v1172_v37 = vsel %vm1168_vm4, %v1163_v56, %v1164_v15  ;;  %v1213_v2 = vrot.slane %v982_v21, 5  ;;  %v1296_v40 = vmax.f32 %v1260_v41, %v1261_v55 }
 0x17c   : > { %v1196_v52 = vadd.f32 %v1172_v37, %v1147_v35  ;;  %v986_v33 = vpop.f32.mrf.mxu0  ;;  %v1446_v42 = vsel %vm1445_vm7, %v1444_v30, %v1443_v25  ;;  %v1294_v44 = vrot.slane %v1293_v12, 1  ;;  %v1262_v56 = vadd.f32 %v2830_v51, %v1244_v48 }
 0x17d   : > { %v1221_v16 = vsel %vm1217_vm5, %v1212_v50, %v1213_v2  ;;  %v1165_v32 = vrot.slane %v986_v33, 4  ;;  %v1297_v53 = vrot.slane %v1296_v40, 4  ;;  %v1120_v25 = vsel %vm1119_vm3, %v1117_v19, %v1118_v49 }
 0x17e   : > { %v1245_v28 = vadd.f32 %v1221_v16, %v1196_v52  ;;  %v988_v18 = vpop.f32.mrf.mxu0  ;;  %v1295_v20 = vmax.f32 %v1293_v12, %v1294_v44  ;;  %v1150_v19 = vadd.f32 %v1120_v25, %v1101_v10 }
 0x17f   : > { %v1171_v35 = vsel %vm1168_vm4, %v1164_v15, %v1165_v32  ;;  %v1214_v47 = vrot.slane %v988_v18, 5  ;;  %v1298_v22 = vmax.f32 %v1296_v40, %v1297_v53 }
 0x180   : > { %v1263_v23 = vadd.f32 %v2834_v11, %v1245_v28  ;;  %v1197_v31 = vadd.f32 %v1171_v35, %v1148_v17  ;;  %v992_v39 = vpop.f32.mrf.mxu0  ;;  %v1334_v0 = vadd.f32 %v2931_v59, %v1295_v20 }
 0x181   : > { %v1220_v58 = vsel %vm1217_vm5, %v1213_v2, %v1214_v47  ;;  %v1166_v34 = vrot.slane %v992_v39, 4  ;;  %v1299_v50 = vrot.slane %v1298_v22, 2 }
 0x182   : > { %v1303_v4 = vmax.f32 %v1262_v56, %v1263_v23  ;;  %v1246_v38 = vadd.f32 %v1220_v58, %v1197_v31  ;;  %v994_v17 = vpop.f32.mrf.mxu0  ;;  %v1447_v15 = vrot.slane %v1334_v0, 5  ;;  %v1341_v0 = vld [vmem:[%s3093_s5 + $0x10] sm:$0xff] }
 0x183   : > { %v1170_v5 = vsel %vm1168_vm4, %v1165_v32, %v1166_v34  ;;  %v1215_v29 = vrot.slane %v994_v17, 5  ;;  %v1300_v8 = vmax.f32 %v1298_v22, %v1299_v50 }
 0x184   : > { %v1304_v14 = vrot.slane %v1303_v4, 4  ;;  %v1198_v57 = vadd.f32 %v1170_v5, %v2955_v36  ;;  %v998_v61 = vpop.f32.mrf.mxu0  ;;  %v1264_v6 = vadd.f32 %v2830_v51, %v1246_v38  ;;  %v1449_v41 = vsel %vm1448_vm8, %v1447_v15, %v1446_v42 }
 0x185   : > { %v1219_v43 = vsel %vm1217_vm5, %v1214_v47, %v1215_v29  ;;  %v1167_v60 = vrot.slane %v998_v61, 4  ;;  %v1301_v37 = vrot.slane %v1300_v8, 1 }
 0x186   : > { %v1305_v62 = vmax.f32 %v1303_v4, %v1304_v14  ;;  %v1247_v3 = vadd.f32 %v1219_v43, %v1198_v57  ;;  %v1000_v21 = vpop.f32.mrf.mxu0  ;;  %v1560_v57 = vpop.permute.xlu1 %1559 }
 0x187   : > { %v1169_v46 = vsel %vm1168_vm4, %v1166_v34, %v1167_v60  ;;  %v1184_v36 = vsel %vm1168_vm4, %v1167_v60, %v1152_v9  ;;  %v1216_v26 = vrot.slane %v1000_v21, 5  ;;  %v1302_v49 = vmax.f32 %v1300_v8, %v1301_v37  ;;  %v1570_v43 = vpop.permute.xlu0 %1569 }
 0x188   : > { %v1306_v2 = vrot.slane %v1305_v62, 2  ;;  %v1265_v55 = vadd.f32 %v2834_v11, %v1247_v3  ;;  %v1199_v48 = vadd.f32 %v1169_v46, %v1150_v19  ;;  %v1200_v52 = vadd.f32 %v1184_v36, %v1151_v13  ;;  %v1882_v19 = vpop.f32.mrf.mxu1 }
 0x189   : > { %v1218_v33 = vsel %vm1217_vm5, %v1215_v29, %v1216_v26  ;;  %v1233_v54 = vsel %vm1217_vm5, %v1216_v26, %v1201_v24  ;;  %v1335_v28 = vadd.f32 %v2931_v59, %v1302_v49  ;;  %v1340_v29 = vld [vmem:[%s3093_s5 + $0x8] sm:$0xff] }
 0x18a   : > { %v1307_v30 = vmax.f32 %v1305_v62, %v1306_v2  ;;  %v1310_v12 = vmax.f32 %v1264_v6, %v1265_v55  ;;  %v1248_v9 = vadd.f32 %v1218_v33, %v1199_v48  ;;  %v1249_v16 = vadd.f32 %v1233_v54, %v1200_v52  ;;  %v1414_v50 = vpop.f32.mrf.mxu1  ;;  %v1555_v8 = vpop.permute.xlu1 %1554 }
 0x18b   : > { %v1450_v63 = vrot.slane %v1335_v28, 4  ;;  %v1565_v2 = vpop.permute.xlu0 %1564 }
 0x18c   : > { %v1311_v32 = vrot.slane %v1310_v12, 4  ;;  %v1266_v10 = vadd.f32 %v2830_v51, %v1248_v9  ;;  %v1308_v40 = vrot.slane %v1307_v30, 1  ;;  %v1267_v18 = vadd.f32 %v2834_v11, %v1249_v16  ;;  %v1885_v14 = vpop.f32.mrf.mxu1 }
 0x18d   : > { %v1452_v47 = vsel %vm1451_vm9, %v1450_v63, %v1449_v41  ;;  %v1609_v63 = vsub.s32 0, %v2632_v7 }
 0x18e   : > { %v1312_v42 = vmax.f32 %v1310_v12, %v1311_v32  ;;  %v1309_v44 = vmax.f32 %v1307_v30, %v1308_v40  ;;  %v1317_v27 = vmax.f32 %v1266_v10, %v1267_v18  ;;  %v1424_v61 = vpop.f32.mrf.mxu1 }
 0x190   : > { %v1313_v35 = vrot.slane %v1312_v42, 2  ;;  %v1336_v24 = vadd.f32 %v2931_v59, %v1309_v44  ;;  %v1318_v53 = vrot.slane %v1317_v27, 4 }
 0x192   : > { %v1314_v56 = vmax.f32 %v1312_v42, %v1313_v35  ;;  %v1453_v23 = vrot.slane %v1336_v24, 3  ;;  %v1319_v31 = vmax.f32 %v1317_v27, %v1318_v53  ;;  %v1600_v42 = vld [vmem:[%s3096_s8] sm:$0x1]  ;;  %v1605_v27 = vpop.permute.xlu0 %1604 }
 0x193   : > { %v1610_v35 = vrot.slane %v1605_v27, %v1609_v63 }
 0x194   : > { %v1315_v51 = vrot.slane %v1314_v56, 1  ;;  %v1455_v39 = vsel %vm1454_vm10, %v1453_v23, %v1452_v47  ;;  %v1320_v20 = vrot.slane %v1319_v31, 2 }
 0x196   : > { %v1316_v25 = vmax.f32 %v1314_v56, %v1315_v51  ;;  %v1321_v58 = vmax.f32 %v1319_v31, %v1320_v20 }
 0x198   : > { %v1337_v11 = vadd.f32 %v2931_v59, %v1316_v25  ;;  %v1322_v34 = vrot.slane %v1321_v58, 1 }
 0x19a   : > { %v1456_v45 = vrot.slane %v1337_v11, 2  ;;  %v1323_v22 = vmax.f32 %v1321_v58, %v1322_v34 }
 0x19c   : > { %v1458_v4 = vsel %vm1457_vm11, %v1456_v45, %v1455_v39  ;;  %v1338_v38 = vadd.f32 %v2931_v59, %v1323_v22  ;;  %v1342_v59 = vld [vmem:[%s3093_s5 + $0x18] sm:$0xff] }
 0x19e   : > { %v1459_v17 = vrot.slane %v1338_v38, 1 }
 0x1a0   : > { %v1461_v5 = vsel %vm1460_vm12, %v1459_v17, %v1458_v4 }
 0x1a1   : > { %1886 = vmatprep.subr.mxu1 %v1461_v5 }
 0x1a2   : > { %1887 = vmatpush3.xpose.msra.mxu1 %v1461_v5 }
 0x1a3   : > { %1894 = vmatprep.subr.mxu1 %v2131_v1 }
 0x1a5   : > { %1889 = vmatmul.mubr.f32.vlgmr.msra.gmra.mxu1 %v1340_v29 }
 0x1a6   : > { %1891 = vmatprep.mubr.f32.mxu1 %v1341_v0 }
 0x1a9   : > { %1892 = vmatmul.mubr.f32.gmra.mxu1 %v1342_v59 }
 0x1aa   : > { %1902 = vmatprep.mubr.msk.f32.mxu1 %vm2133_vm13, %v2131_v1 }
 0x265   : > { %v1890_v13 = vpop.f32.mrf.mxu1 }
 0x266   : > { %v1535_v60 = vadd.f32 %v1890_v13, %v1882_v19 }
 0x267   : > { %v1529_v15 = vpop.f32.mrf.mxu1 }
 0x268   : > { %v1573_v62 = vadd.f32 %v1560_v57, %v1535_v60  ;;  %v1530_v6 = vadd.f32 %v1529_v15, %v1414_v50 }
 0x269   : > { %v1893_v3 = vpop.f32.mrf.mxu1 }
 0x26a   : > { %v1572_v21 = vadd.f32 %v1555_v8, %v1530_v6  ;;  %v1545_v46 = vadd.f32 %v1893_v3, %v1885_v14  ;;  %v1855_v36 = vmul.f32 -1.442695, %v1573_v62 }
 0x26b   : > { %v1539_v26 = vpop.f32.mrf.mxu1 }
 0x26c   : > { %v1575_v41 = vadd.f32 %v1570_v43, %v1545_v46  ;;  %v1540_v37 = vadd.f32 %v1539_v26, %v1424_v61  ;;  %v1854_v55 = vmul.f32 -1.442695, %v1572_v21  ;;  %1983 = vpow2.f32 %v1855_v36 }
 0x26e   : > { %v1857_v48 = vmul.f32 -1.442695, %v1575_v41  ;;  %v1574_v52 = vadd.f32 %v1565_v2, %v1540_v37 }
 0x270   : > { %1985 = vpow2.f32 %v1857_v48  ;;  %v1856_v33 = vmul.f32 -1.442695, %v1574_v52 }
 0x271   : > { %1987 = vpow2.f32 %v1854_v55 }
 0x272   : > { %1989 = vpow2.f32 %v1856_v33 }
 0x279   : > { %v1984_v54 = vpop.eup %1983 }
 0x27a   : > { %v1589_v16 = vadd.f32 1.0, %v1984_v54 }
 0x27d   : > { %v1986_v30 = vpop.eup %1985 }
 0x27e   : > { %v1988_v12 = vpop.eup %1987  ;;  %v1591_v9 = vadd.f32 1.0, %v1986_v30 }
 0x27f   : > { %v1990_v49 = vpop.eup %1989  ;;  %v1588_v10 = vadd.f32 1.0, %v1988_v12 }
 0x280   : > { %1991 = vrcp.f32 %v1591_v9  ;;  %v1590_v32 = vadd.f32 1.0, %v1990_v49 }
 0x282   : > { %1993 = vrcp.f32 %v1590_v32 }
 0x283   : > { %1995 = vrcp.f32 %v1589_v16 }
 0x284   : > { %1997 = vrcp.f32 %v1588_v10 }
 0x28d   : > { %v1992_v40 = vpop.eup %1991 }
 0x28e   : > { %1895 = vmatpush3.msra.mxu1 %v1992_v40 }
 0x28f   : > { %v1994_v28 = vpop.eup %1993  ;;  %1896 = vmatprep.subr.mxu1 %v2131_v1 }
 0x290   : > { %1897 = vmatpush3.msra.mxu1 %v1994_v28  ;;  %v1996_v18 = vpop.eup %1995 }
 0x291   : > { %1898 = vmatprep.subr.mxu1 %v2131_v1  ;;  %v1998_v44 = vpop.eup %1997 }
 0x292   : > { %1899 = vmatpush3.msra.mxu1 %v1996_v18 }
 0x293   : > { %1900 = vmatprep.subr.mxu1 %v2131_v1 }
 0x294   : > { %1901 = vmatpush3.msra.mxu1 %v1998_v44 }
 0x295   : > { %1903 = vmatmul.mubr.msk.f32.vlgmr.msra.gmra.mxu1 %vm1611_vm14, %v1600_v42 }
 0x355   : > { %v1681_v24 = vpop.f32.mrf.mxu1 }
 0x356   : > { %v1682_v47 = vadd.f32 %v1681_v24, %v1610_v35 }
 0x357   : > { %v1904_v53 = vpop.f32.mrf.mxu1 }
 0x358   : > { %v1859_v56 = vmul.f32 -1.442695, %v1682_v47 }
 0x35a   : > { %1999 = vpow2.f32 %v1859_v56 }
 0x367   : > { %v2000_v23 = vpop.eup %1999 }
 0x368   : > { %v1688_v31 = vadd.f32 1.0, %v2000_v23 }
 0x36a   : > { %2001 = vrcp.f32 %v1688_v31 }
 0x377   : > { %v2002_v1 = vpop.eup %2001 }
 0x378   : > { %1692 = vst.msk [vmem:[%s406_s9] sm:$0x1] %vm1691_vm15, %v2002_v1 }
 0x379   : > { %2070 = shalt.err (!%p2067_p5)
}
 0x37a   : > { %s2071_s22 = scalar_lea.hbm %s3051_s23, 16  ;;  %s2075_s27 = scalar_lea.hbm %s3098_s10, 32 }
 0x37b   : > { %p2072_p9 = scmp.ne.s32.totalorder %s3051_s23, %s2071_s22  ;;  %p2076_p4 = scmp.lt.s32.totalorder %s3051_s23, %s3098_s10 }
 0x37c   : > { %p2077_p6 = scmp.lt.s32.totalorder %s2075_s27, %s2071_s22 }
 0x37d   : > { %p2073_p12 = pnand %p2072_p9, %p3122_p11 }
 0x37e   : > { %p2078_p8 = por %p2077_p6, %p2076_p4 }
 0x37f   : > { %p2074_p1 = pneg %p2073_p12 }
 0x381   : > { %p2079_p3 = pnand %p2078_p8, %p2074_p1 }
 0x383   : > { %2082 = shalt.err (!%p2079_p3)
}
 0x384   : > { %1925 = dma.vmem_to_hbm [thread:$0]  (%p3122_p11), %s1707_s25, 16, %s3051_s23, %s1694_s21  }
 0x385 PF: > { %s3123_s29 = sld [smem:[#allocation12_spill]]  ;;  %s1718_s9 = sand.u32 1, %s2113_s15  }
 0x386   : > { %p3125_p10 = scmp.ge.s32.totalorder %s2125_s18, 2  ;;  %s1719_s14 = scalar_lea.sflag [#allocation5], %s1718_s9 }
 0x38b   : > { %p3124_p7 = scmp.ne.s32.totalorder %s3123_s29, 0 }
 0x38d   : > { %p1936_p2 = pnand %p3125_p10, %p3124_p7 }
 0x38f   : > { %p1937_p13 = pneg %p1936_p2 }
 0x391   : > { %2108 = dma.done.wait (%p1937_p13), %s1719_s14, 16  }
 0x392   : > { %2110 = vsyncadd (%p1937_p13), %s1719_s14, 4294967280  ;;  %s3126_s18 = sld [smem:[#allocation13_spill]]  ;;  %s3128_s15 = smov %s2117_s16 }
 0x393   : > { %s3127_s26 = sld [smem:[#allocation14_spill]]  ;;  %s3129_s16 = smov %s2121_s17 }
 0x398   : > { %p26_p0 = scmp.ge.s32.totalorder %s3126_s18, 4  }
 0x399   : > { %s3130_s17 = smov %s3127_s26 }
 0x39a   :  { %28 = sbr.rel (!%p26_p0) target bundleno = 9 (0x9), region = 112 }
 0x39f   :  { %1723 = vsyncpa [#allocation4], 1 }
 0x3a0   :  { %1725 = vsyncpa [#allocation4 + $0x1], 1 }
 0x3a1   :  { %1726 = vsyncpa [#allocation7], 1 }
 0x3a2   :  { %1727 = vsyncpa [#allocation5], 1 }
 0x3a3   :  { %1729 = vsyncpa [#allocation5 + $0x1], 1 }

</bundles_post_ra>
